<compile_context>
chip_gen: v6e
topology: v6e:2x2x1
jax: 0.10.0
libtpu: 0.0.40
codegen_flags: <defaults>
</compile_context>

<pallas_src>
import jax
import jax.numpy as jnp
from jax.experimental import pallas as pl
from jax.experimental.pallas import tpu as pltpu


def ctlstm_kernel(x2d_ref, h0_ref, c0_ref,
                  w_ih0_ref, w_hh0_ref, b0_ref,
                  w_ih1_ref, w_hh1_ref, b1_ref,
                  w1post_ref, fcb_ref,
                  out_ref, hn_ref, cn_ref):
    # x2d_ref:   (T*Bp, Din)  time-major, batch-flattened input
    # h0/c0_ref: (2, Bp, H)
    # w_ih0:     (Din, 4H), w_hh0: (H, 4H), b0: (1, 4H)      (layer 0, g-cols x2)
    # w_ih1:     (H, 4H),   w_hh1: (H, 4H), b1: (1, 4H)      (layer 1, g-cols x2)
    # w1post:    (T*H, 4H+Op): rows [t*H:(t+1)*H] = [w_hh1 | fcw_t]
    # fcb:       (1, Op)
    Bp = h0_ref.shape[1]
    H = h0_ref.shape[2]
    G = 4 * H
    T = x2d_ref.shape[0] // Bp
    Op = out_ref.shape[1]

    w_hh0 = w_hh0_ref[...]
    w_ih1 = w_ih1_ref[...]
    # Pre-broadcast layer-1 bias once (JAX does not CSE broadcast_in_dim).
    b1 = jnp.broadcast_to(b1_ref[...], (Bp, G))

    # Hoisted layer-0 input projection: one big matmul, bias folded in.
    xproj = (jnp.dot(x2d_ref[...], w_ih0_ref[...],
                     preferred_element_type=jnp.float32)
             + b0_ref[...])                                   # (T*Bp, 4H)

    def lstm_step(gates, c):
        # Single EUP pass: g-gate pre-activation was pre-scaled by 2 in the
        # wrapper, so tanh(g_orig) == 2*sigmoid(2*g_orig) - 1 (VALU fixup).
        s = jax.nn.sigmoid(gates)
        i = s[:, 0:H]
        f = s[:, H:2 * H]
        g = 2.0 * s[:, 2 * H:3 * H] - 1.0
        o = s[:, 3 * H:4 * H]
        c_new = f * c + i * g
        h_new = o * jnp.tanh(c_new)
        return h_new, c_new

    h0 = h0_ref[0]
    c0 = c0_ref[0]
    h1 = h0_ref[1]
    c1 = c0_ref[1]

    # Layer-1 recurrent term (+bias) for step 0: depends only on the initial
    # h1, so it sits off the step-0 layer-0 critical path.
    r1b = jnp.dot(h1, w_hh1_ref[...], preferred_element_type=jnp.float32) + b1

    # FC accumulator, initialized with the (lane-padded) FC bias.
    acc = jnp.broadcast_to(fcb_ref[...], (Bp, Op))

    # TODO(synk): explicit MXU RHS latching (pltpu.matmul_push_rhs/acc_lhs/pop)
    # could shave the per-step RHS re-stream; left to jnp.dot + the Mosaic
    # scheduler to avoid subtle staging-register/accumulator-index bugs.
    for t in range(T):      # T is small & static: fully unrolled at trace time
        # --- layer 0: recurrent matmul only (input part precomputed) ---
        g0 = (xproj[t * Bp:(t + 1) * Bp]
              + jnp.dot(h0, w_hh0, preferred_element_type=jnp.float32))
        h0, c0 = lstm_step(g0, c0)

        # --- layer 1: only the input dot + add + nonlinearities are on the
        #     serial chain; the recurrent term r1b came from h1(t-1) ---
        g1 = jnp.dot(h0, w_ih1, preferred_element_type=jnp.float32) + r1b
        h1, c1 = lstm_step(g1, c1)

        # --- fused post-h1 dot: (Bp,H) x (H, 4H+Op) produces next step's
        #     layer-1 recurrent term and this step's FC contribution; both are
        #     off the next step's layer-0 chain and fill MXU slack ---
        post = jnp.dot(h1, w1post_ref[t * H:(t + 1) * H, :],
                       preferred_element_type=jnp.float32)
        r1b = post[:, 0:G] + b1
        acc = acc + post[:, G:]

    out_ref[...] = acc
    hn_ref[0] = h0
    hn_ref[1] = h1
    cn_ref[0] = c0
    cn_ref[1] = c1


def ctlstm_forward(x, hidden, params, seq_len, hidden_dim, output_size):
    """x: (B, T, Din) batch_first (like PyTorch); hidden=(h0,c0) each (2,B,H)."""
    B, T, Din = x.shape
    assert T == seq_len
    H = hidden_dim
    G = 4 * H
    O = output_size
    Bp = ((B + 7) // 8) * 8          # pad batch to f32 sublane minimum
    Op = ((O + 127) // 128) * 128    # FC columns padded so the fused per-step
                                     # RHS is (H, 4H+Op) with lane-aligned slices

    if hidden is None:
        hidden = (jnp.zeros((2, B, H), jnp.float32),
                  jnp.zeros((2, B, H), jnp.float32))
    h0, c0 = hidden

    # Pad batch; padded rows compute garbage that is sliced off afterwards.
    x_p = jnp.pad(x, ((0, Bp - B), (0, 0), (0, 0)))
    h0_p = jnp.pad(h0, ((0, 0), (0, Bp - B), (0, 0)))
    c0_p = jnp.pad(c0, ((0, 0), (0, Bp - B), (0, 0)))

    # Time-major, batch-flattened input for the hoisted layer-0 projection.
    x2d = jnp.transpose(x_p, (1, 0, 2)).reshape(T * Bp, Din)  # (T*Bp, Din)

    # g-gate columns pre-scaled by 2 so tanh collapses into the single sigmoid.
    gate_scale = jnp.concatenate([jnp.ones((H,), jnp.float32),
                                  jnp.ones((H,), jnp.float32),
                                  jnp.full((H,), 2.0, jnp.float32),
                                  jnp.ones((H,), jnp.float32)])

    w_ih0 = params['w_ih_l0'].T * gate_scale[None, :]          # (Din, 4H)
    w_hh0 = params['w_hh_l0'].T * gate_scale[None, :]          # (H, 4H)
    b0 = ((params['b_ih_l0'] + params['b_hh_l0']) * gate_scale).reshape(1, G)
    w_ih1 = params['w_ih_l1'].T * gate_scale[None, :]          # (H, 4H)
    w_hh1 = params['w_hh_l1'].T * gate_scale[None, :]          # (H, 4H)
    b1 = ((params['b_ih_l1'] + params['b_hh_l1']) * gate_scale).reshape(1, G)

    # FC weight (O, T*H) -> (T*H, Op); per-step block t is fcw[t*H:(t+1)*H].
    fcw_p = jnp.pad(params['fc_w'].T, ((0, 0), (0, Op - O)))   # (T*H, Op)
    fcb = jnp.pad(params['fc_b'].reshape(1, O), ((0, 0), (0, Op - O)))

    # Fused per-step RHS: rows [t*H:(t+1)*H] = [w_hh1 | fcw_t]   -> (T*H, 4H+Op)
    w1post = jnp.concatenate([jnp.tile(w_hh1, (T, 1)), fcw_p], axis=1)

    # Everything is tiny (<<1 MiB): keep fully VMEM-resident, no grid.
    # TODO(synk): at production B add a batch grid (dimension_semantics=
    # ("parallel",)) so v7x's 2 TCs split the batch, and re-budget VMEM against
    # v7x's 64 MiB physical / 32 MiB scoped default (v5e scoped default is
    # 16 MiB) — x2d / xproj are the first buffers to grow; stream x over a
    # grid-of-T or set vmem_limit_bytes before that point.
    vmem = pl.BlockSpec(memory_space=pltpu.MemorySpace.VMEM)
    out, hn, cn = pl.pallas_call(
        ctlstm_kernel,
        out_shape=(jax.ShapeDtypeStruct((Bp, Op), jnp.float32),
                   jax.ShapeDtypeStruct((2, Bp, H), jnp.float32),
                   jax.ShapeDtypeStruct((2, Bp, H), jnp.float32)),
        in_specs=[vmem] * 11,
        out_specs=(vmem, vmem, vmem),
    )(x2d, h0_p, c0_p, w_ih0, w_hh0, b0, w_ih1, w_hh1, b1, w1post, fcb)
    return out[:B, :O], (hn[:, :B], cn[:, :B])


def ctlstm_reference(x, hidden, params):
    """Pure-JAX reference matching torch.nn.LSTM(batch_first=True, num_layers=2)."""
    B, T, Din = x.shape
    h0, c0 = hidden
    L, _, H = h0.shape
    hs = [h0[l] for l in range(L)]
    cs = [c0[l] for l in range(L)]
    outs = []
    for t in range(T):
        inp = x[:, t, :]
        for l in range(L):
            w_ih = params[f'w_ih_l{l}']
            w_hh = params[f'w_hh_l{l}']
            b = params[f'b_ih_l{l}'] + params[f'b_hh_l{l}']
            gates = inp @ w_ih.T + hs[l] @ w_hh.T + b
            i = jax.nn.sigmoid(gates[:, :H])
            f = jax.nn.sigmoid(gates[:, H:2 * H])
            g = jnp.tanh(gates[:, 2 * H:3 * H])
            o = jax.nn.sigmoid(gates[:, 3 * H:])
            cs[l] = f * cs[l] + i * g
            hs[l] = o * jnp.tanh(cs[l])
            inp = hs[l]
        outs.append(hs[-1])
    lstm_out = jnp.stack(outs, axis=1)                        # (B, T, H)
    out = lstm_out.reshape(B, T * H) @ params['fc_w'].T + params['fc_b']
    return out, (jnp.stack(hs), jnp.stack(cs))


if __name__ == "__main__":
    # Small shapes consistent with the module's forward.
    batch = 2
    input_size = 10
    seq_len = 8
    hidden_dim = 32
    n_layers = 2          # fixed at 2 (module default); kernel unrolls both layers
    output_size = 1

    key = jax.random.PRNGKey(0)
    keys = jax.random.split(key, 12)
    k = 1.0 / jnp.sqrt(hidden_dim)

    def u(kk, shape):
        return jax.random.uniform(kk, shape, jnp.float32, -k, k)

    params = {
        'w_ih_l0': u(keys[0], (4 * hidden_dim, input_size)),
        'w_hh_l0': u(keys[1], (4 * hidden_dim, hidden_dim)),
        'b_ih_l0': u(keys[2], (4 * hidden_dim,)),
        'b_hh_l0': u(keys[3], (4 * hidden_dim,)),
        'w_ih_l1': u(keys[4], (4 * hidden_dim, hidden_dim)),
        'w_hh_l1': u(keys[5], (4 * hidden_dim, hidden_dim)),
        'b_ih_l1': u(keys[6], (4 * hidden_dim,)),
        'b_hh_l1': u(keys[7], (4 * hidden_dim,)),
        'fc_w':    u(keys[8], (output_size, hidden_dim * seq_len)),
        'fc_b':    u(keys[9], (output_size,)),
    }

    x = jax.random.normal(keys[10], (batch, seq_len, input_size), jnp.float32)
    hidden = (jnp.zeros((n_layers, batch, hidden_dim), jnp.float32),
              jnp.zeros((n_layers, batch, hidden_dim), jnp.float32))

    out, (hn, cn) = ctlstm_forward(x, hidden, params,
                                   seq_len, hidden_dim, output_size)
    out = jax.block_until_ready(out)
    hn = jax.block_until_ready(hn)
    cn = jax.block_until_ready(cn)

    out_ref, (hn_ref, cn_ref) = ctlstm_reference(x, hidden, params)
    # Note: gate tanh is computed as 2*sigmoid(2x)-1 (single EUP pass); this
    # differs from jnp.tanh by a few ULPs, well inside the tolerance below.
    assert jnp.allclose(out, out_ref, atol=1e-4, rtol=1e-4)
    assert jnp.allclose(hn, hn_ref, atol=1e-4, rtol=1e-4)
    assert jnp.allclose(cn, cn_ref, atol=1e-4, rtol=1e-4)

    # TODO(synk): regularize()/prox()/GC() are training-time weight-norm
    # utilities (not part of forward) and are left out of the kernel.
    print("KERNEL_OK")
</pallas_src>

<mosaic_0001>
module attributes {stable_mosaic.version = 11 : i64} {
  func.func @ctlstm_kernel(%arg0: memref<64x10xf32, #tpu.memory_space<vmem>>, %arg1: memref<2x8x32xf32, #tpu.memory_space<vmem>>, %arg2: memref<2x8x32xf32, #tpu.memory_space<vmem>>, %arg3: memref<10x128xf32, #tpu.memory_space<vmem>>, %arg4: memref<32x128xf32, #tpu.memory_space<vmem>>, %arg5: memref<1x128xf32, #tpu.memory_space<vmem>>, %arg6: memref<32x128xf32, #tpu.memory_space<vmem>>, %arg7: memref<32x128xf32, #tpu.memory_space<vmem>>, %arg8: memref<1x128xf32, #tpu.memory_space<vmem>>, %arg9: memref<256x256xf32, #tpu.memory_space<vmem>>, %arg10: memref<1x128xf32, #tpu.memory_space<vmem>>, %arg11: memref<8x128xf32, #tpu.memory_space<vmem>>, %arg12: memref<2x8x32xf32, #tpu.memory_space<vmem>>, %arg13: memref<2x8x32xf32, #tpu.memory_space<vmem>>) attributes {dimension_semantics = [], scalar_prefetch = 0 : i64, scratch_operands = 0 : i64, tpu.core_type = #tpu.core_type<tc>} {
    %c0 = arith.constant 0 : index
    %c0_0 = arith.constant 0 : index
    %0 = vector.load %arg4[%c0, %c0_0] : memref<32x128xf32, #tpu.memory_space<vmem>>, vector<32x128xf32>
    %c0_1 = arith.constant 0 : index
    %c0_2 = arith.constant 0 : index
    %1 = vector.load %arg6[%c0_1, %c0_2] : memref<32x128xf32, #tpu.memory_space<vmem>>, vector<32x128xf32>
    %c0_3 = arith.constant 0 : index
    %c0_4 = arith.constant 0 : index
    %2 = vector.load %arg8[%c0_3, %c0_4] : memref<1x128xf32, #tpu.memory_space<vmem>>, vector<1x128xf32>
    %3 = vector.shape_cast %2 : vector<1x128xf32> to vector<1x128xf32>
    %4 = vector.broadcast %3 : vector<1x128xf32> to vector<8x128xf32>
    %c0_5 = arith.constant 0 : index
    %c0_6 = arith.constant 0 : index
    %5 = vector.load %arg0[%c0_5, %c0_6] : memref<64x10xf32, #tpu.memory_space<vmem>>, vector<64x10xf32>
    %c0_7 = arith.constant 0 : index
    %c0_8 = arith.constant 0 : index
    %6 = vector.load %arg3[%c0_7, %c0_8] : memref<10x128xf32, #tpu.memory_space<vmem>>, vector<10x128xf32>
    %cst = arith.constant dense<0.000000e+00> : vector<64x128xf32>
    %7 = tpu.matmul %5, %6, %cst {dimension_numbers = #tpu.dot_dimension_numbers<[1], [0], [0], [1], [0, 0, 1, 1], [], []>} : vector<64x10xf32>, vector<10x128xf32>, vector<64x128xf32> -> vector<64x128xf32>
    %c0_9 = arith.constant 0 : index
    %c0_10 = arith.constant 0 : index
    %8 = vector.load %arg5[%c0_9, %c0_10] : memref<1x128xf32, #tpu.memory_space<vmem>>, vector<1x128xf32>
    %9 = vector.broadcast %8 : vector<1x128xf32> to vector<64x128xf32>
    %10 = arith.addf %7, %9 : vector<64x128xf32>
    %c0_11 = arith.constant 0 : index
    %c0_12 = arith.constant 0 : index
    %c0_13 = arith.constant 0 : index
    %11 = vector.load %arg1[%c0_11, %c0_12, %c0_13] : memref<2x8x32xf32, #tpu.memory_space<vmem>>, vector<1x8x32xf32>
    %12 = vector.shape_cast %11 : vector<1x8x32xf32> to vector<8x32xf32>
    %c0_14 = arith.constant 0 : index
    %c0_15 = arith.constant 0 : index
    %c0_16 = arith.constant 0 : index
    %13 = vector.load %arg2[%c0_14, %c0_15, %c0_16] : memref<2x8x32xf32, #tpu.memory_space<vmem>>, vector<1x8x32xf32>
    %14 = vector.shape_cast %13 : vector<1x8x32xf32> to vector<8x32xf32>
    %c1 = arith.constant 1 : index
    %c0_17 = arith.constant 0 : index
    %c0_18 = arith.constant 0 : index
    %15 = vector.load %arg1[%c1, %c0_17, %c0_18] : memref<2x8x32xf32, #tpu.memory_space<vmem>>, vector<1x8x32xf32>
    %16 = vector.shape_cast %15 : vector<1x8x32xf32> to vector<8x32xf32>
    %c1_19 = arith.constant 1 : index
    %c0_20 = arith.constant 0 : index
    %c0_21 = arith.constant 0 : index
    %17 = vector.load %arg2[%c1_19, %c0_20, %c0_21] : memref<2x8x32xf32, #tpu.memory_space<vmem>>, vector<1x8x32xf32>
    %18 = vector.shape_cast %17 : vector<1x8x32xf32> to vector<8x32xf32>
    %c0_22 = arith.constant 0 : index
    %c0_23 = arith.constant 0 : index
    %19 = vector.load %arg7[%c0_22, %c0_23] : memref<32x128xf32, #tpu.memory_space<vmem>>, vector<32x128xf32>
    %cst_24 = arith.constant dense<0.000000e+00> : vector<8x128xf32>
    %20 = tpu.matmul %16, %19, %cst_24 {dimension_numbers = #tpu.dot_dimension_numbers<[1], [0], [0], [1], [0, 0, 1, 1], [], []>} : vector<8x32xf32>, vector<32x128xf32>, vector<8x128xf32> -> vector<8x128xf32>
    %21 = arith.addf %20, %4 : vector<8x128xf32>
    %c0_25 = arith.constant 0 : index
    %c0_26 = arith.constant 0 : index
    %22 = vector.load %arg10[%c0_25, %c0_26] : memref<1x128xf32, #tpu.memory_space<vmem>>, vector<1x128xf32>
    %23 = vector.shape_cast %22 : vector<1x128xf32> to vector<1x128xf32>
    %24 = vector.broadcast %23 : vector<1x128xf32> to vector<8x128xf32>
    %25 = vector.extract_strided_slice %10 {offsets = [0, 0], sizes = [8, 128], strides = [1, 1]} : vector<64x128xf32> to vector<8x128xf32>
    %cst_27 = arith.constant dense<0.000000e+00> : vector<8x128xf32>
    %26 = tpu.matmul %12, %0, %cst_27 {dimension_numbers = #tpu.dot_dimension_numbers<[1], [0], [0], [1], [0, 0, 1, 1], [], []>} : vector<8x32xf32>, vector<32x128xf32>, vector<8x128xf32> -> vector<8x128xf32>
    %27 = arith.addf %25, %26 : vector<8x128xf32>
    %28 = arith.negf %27 : vector<8x128xf32>
    %29 = math.exp %28 : vector<8x128xf32>
    %cst_28 = arith.constant 1.000000e+00 : f32
    %30 = vector.broadcast %cst_28 : f32 to vector<8x128xf32>
    %31 = arith.addf %30, %29 : vector<8x128xf32>
    %32 = arith.divf %30, %31 : vector<8x128xf32>
    %33 = vector.extract_strided_slice %32 {offsets = [0, 0], sizes = [8, 32], strides = [1, 1]} : vector<8x128xf32> to vector<8x32xf32>
    %34 = vector.extract_strided_slice %32 {offsets = [0, 32], sizes = [8, 32], strides = [1, 1]} : vector<8x128xf32> to vector<8x32xf32>
    %35 = vector.extract_strided_slice %32 {offsets = [0, 64], sizes = [8, 32], strides = [1, 1]} : vector<8x128xf32> to vector<8x32xf32>
    %cst_29 = arith.constant 2.000000e+00 : f32
    %36 = vector.broadcast %cst_29 : f32 to vector<8x32xf32>
    %37 = arith.mulf %36, %35 : vector<8x32xf32>
    %cst_30 = arith.constant 1.000000e+00 : f32
    %38 = vector.broadcast %cst_30 : f32 to vector<8x32xf32>
    %39 = arith.subf %37, %38 : vector<8x32xf32>
    %40 = vector.extract_strided_slice %32 {offsets = [0, 96], sizes = [8, 32], strides = [1, 1]} : vector<8x128xf32> to vector<8x32xf32>
    %41 = arith.mulf %34, %14 : vector<8x32xf32>
    %42 = arith.mulf %33, %39 : vector<8x32xf32>
    %43 = arith.addf %41, %42 : vector<8x32xf32>
    %44 = math.tanh %43 : vector<8x32xf32>
    %45 = arith.mulf %40, %44 : vector<8x32xf32>
    %cst_31 = arith.constant dense<0.000000e+00> : vector<8x128xf32>
    %46 = tpu.matmul %45, %1, %cst_31 {dimension_numbers = #tpu.dot_dimension_numbers<[1], [0], [0], [1], [0, 0, 1, 1], [], []>} : vector<8x32xf32>, vector<32x128xf32>, vector<8x128xf32> -> vector<8x128xf32>
    %47 = arith.addf %46, %21 : vector<8x128xf32>
    %48 = arith.negf %47 : vector<8x128xf32>
    %49 = math.exp %48 : vector<8x128xf32>
    %cst_32 = arith.constant 1.000000e+00 : f32
    %50 = vector.broadcast %cst_32 : f32 to vector<8x128xf32>
    %51 = arith.addf %50, %49 : vector<8x128xf32>
    %52 = arith.divf %50, %51 : vector<8x128xf32>
    %53 = vector.extract_strided_slice %52 {offsets = [0, 0], sizes = [8, 32], strides = [1, 1]} : vector<8x128xf32> to vector<8x32xf32>
    %54 = vector.extract_strided_slice %52 {offsets = [0, 32], sizes = [8, 32], strides = [1, 1]} : vector<8x128xf32> to vector<8x32xf32>
    %55 = vector.extract_strided_slice %52 {offsets = [0, 64], sizes = [8, 32], strides = [1, 1]} : vector<8x128xf32> to vector<8x32xf32>
    %cst_33 = arith.constant 2.000000e+00 : f32
    %56 = vector.broadcast %cst_33 : f32 to vector<8x32xf32>
    %57 = arith.mulf %56, %55 : vector<8x32xf32>
    %cst_34 = arith.constant 1.000000e+00 : f32
    %58 = vector.broadcast %cst_34 : f32 to vector<8x32xf32>
    %59 = arith.subf %57, %58 : vector<8x32xf32>
    %60 = vector.extract_strided_slice %52 {offsets = [0, 96], sizes = [8, 32], strides = [1, 1]} : vector<8x128xf32> to vector<8x32xf32>
    %61 = arith.mulf %54, %18 : vector<8x32xf32>
    %62 = arith.mulf %53, %59 : vector<8x32xf32>
    %63 = arith.addf %61, %62 : vector<8x32xf32>
    %64 = math.tanh %63 : vector<8x32xf32>
    %65 = arith.mulf %60, %64 : vector<8x32xf32>
    %c0_35 = arith.constant 0 : index
    %c0_36 = arith.constant 0 : index
    %66 = vector.load %arg9[%c0_35, %c0_36] : memref<256x256xf32, #tpu.memory_space<vmem>>, vector<32x256xf32>
    %cst_37 = arith.constant dense<0.000000e+00> : vector<8x256xf32>
    %67 = tpu.matmul %65, %66, %cst_37 {dimension_numbers = #tpu.dot_dimension_numbers<[1], [0], [0], [1], [0, 0, 1, 1], [], []>} : vector<8x32xf32>, vector<32x256xf32>, vector<8x256xf32> -> vector<8x256xf32>
    %68 = vector.extract_strided_slice %67 {offsets = [0, 0], sizes = [8, 128], strides = [1, 1]} : vector<8x256xf32> to vector<8x128xf32>
    %69 = arith.addf %68, %4 : vector<8x128xf32>
    %70 = vector.extract_strided_slice %67 {offsets = [0, 128], sizes = [8, 128], strides = [1, 1]} : vector<8x256xf32> to vector<8x128xf32>
    %71 = arith.addf %24, %70 : vector<8x128xf32>
    %72 = vector.extract_strided_slice %10 {offsets = [8, 0], sizes = [8, 128], strides = [1, 1]} : vector<64x128xf32> to vector<8x128xf32>
    %cst_38 = arith.constant dense<0.000000e+00> : vector<8x128xf32>
    %73 = tpu.matmul %45, %0, %cst_38 {dimension_numbers = #tpu.dot_dimension_numbers<[1], [0], [0], [1], [0, 0, 1, 1], [], []>} : vector<8x32xf32>, vector<32x128xf32>, vector<8x128xf32> -> vector<8x128xf32>
    %74 = arith.addf %72, %73 : vector<8x128xf32>
    %75 = arith.negf %74 : vector<8x128xf32>
    %76 = math.exp %75 : vector<8x128xf32>
    %cst_39 = arith.constant 1.000000e+00 : f32
    %77 = vector.broadcast %cst_39 : f32 to vector<8x128xf32>
    %78 = arith.addf %77, %76 : vector<8x128xf32>
    %79 = arith.divf %77, %78 : vector<8x128xf32>
    %80 = vector.extract_strided_slice %79 {offsets = [0, 0], sizes = [8, 32], strides = [1, 1]} : vector<8x128xf32> to vector<8x32xf32>
    %81 = vector.extract_strided_slice %79 {offsets = [0, 32], sizes = [8, 32], strides = [1, 1]} : vector<8x128xf32> to vector<8x32xf32>
    %82 = vector.extract_strided_slice %79 {offsets = [0, 64], sizes = [8, 32], strides = [1, 1]} : vector<8x128xf32> to vector<8x32xf32>
    %cst_40 = arith.constant 2.000000e+00 : f32
    %83 = vector.broadcast %cst_40 : f32 to vector<8x32xf32>
    %84 = arith.mulf %83, %82 : vector<8x32xf32>
    %cst_41 = arith.constant 1.000000e+00 : f32
    %85 = vector.broadcast %cst_41 : f32 to vector<8x32xf32>
    %86 = arith.subf %84, %85 : vector<8x32xf32>
    %87 = vector.extract_strided_slice %79 {offsets = [0, 96], sizes = [8, 32], strides = [1, 1]} : vector<8x128xf32> to vector<8x32xf32>
    %88 = arith.mulf %81, %43 : vector<8x32xf32>
    %89 = arith.mulf %80, %86 : vector<8x32xf32>
    %90 = arith.addf %88, %89 : vector<8x32xf32>
    %91 = math.tanh %90 : vector<8x32xf32>
    %92 = arith.mulf %87, %91 : vector<8x32xf32>
    %cst_42 = arith.constant dense<0.000000e+00> : vector<8x128xf32>
    %93 = tpu.matmul %92, %1, %cst_42 {dimension_numbers = #tpu.dot_dimension_numbers<[1], [0], [0], [1], [0, 0, 1, 1], [], []>} : vector<8x32xf32>, vector<32x128xf32>, vector<8x128xf32> -> vector<8x128xf32>
    %94 = arith.addf %93, %69 : vector<8x128xf32>
    %95 = arith.negf %94 : vector<8x128xf32>
    %96 = math.exp %95 : vector<8x128xf32>
    %cst_43 = arith.constant 1.000000e+00 : f32
    %97 = vector.broadcast %cst_43 : f32 to vector<8x128xf32>
    %98 = arith.addf %97, %96 : vector<8x128xf32>
    %99 = arith.divf %97, %98 : vector<8x128xf32>
    %100 = vector.extract_strided_slice %99 {offsets = [0, 0], sizes = [8, 32], strides = [1, 1]} : vector<8x128xf32> to vector<8x32xf32>
    %101 = vector.extract_strided_slice %99 {offsets = [0, 32], sizes = [8, 32], strides = [1, 1]} : vector<8x128xf32> to vector<8x32xf32>
    %102 = vector.extract_strided_slice %99 {offsets = [0, 64], sizes = [8, 32], strides = [1, 1]} : vector<8x128xf32> to vector<8x32xf32>
    %cst_44 = arith.constant 2.000000e+00 : f32
    %103 = vector.broadcast %cst_44 : f32 to vector<8x32xf32>
    %104 = arith.mulf %103, %102 : vector<8x32xf32>
    %cst_45 = arith.constant 1.000000e+00 : f32
    %105 = vector.broadcast %cst_45 : f32 to vector<8x32xf32>
    %106 = arith.subf %104, %105 : vector<8x32xf32>
    %107 = vector.extract_strided_slice %99 {offsets = [0, 96], sizes = [8, 32], strides = [1, 1]} : vector<8x128xf32> to vector<8x32xf32>
    %108 = arith.mulf %101, %63 : vector<8x32xf32>
    %109 = arith.mulf %100, %106 : vector<8x32xf32>
    %110 = arith.addf %108, %109 : vector<8x32xf32>
    %111 = math.tanh %110 : vector<8x32xf32>
    %112 = arith.mulf %107, %111 : vector<8x32xf32>
    %c32 = arith.constant 32 : index
    %c0_46 = arith.constant 0 : index
    %113 = vector.load %arg9[%c32, %c0_46] : memref<256x256xf32, #tpu.memory_space<vmem>>, vector<32x256xf32>
    %cst_47 = arith.constant dense<0.000000e+00> : vector<8x256xf32>
    %114 = tpu.matmul %112, %113, %cst_47 {dimension_numbers = #tpu.dot_dimension_numbers<[1], [0], [0], [1], [0, 0, 1, 1], [], []>} : vector<8x32xf32>, vector<32x256xf32>, vector<8x256xf32> -> vector<8x256xf32>
    %115 = vector.extract_strided_slice %114 {offsets = [0, 0], sizes = [8, 128], strides = [1, 1]} : vector<8x256xf32> to vector<8x128xf32>
    %116 = arith.addf %115, %4 : vector<8x128xf32>
    %117 = vector.extract_strided_slice %114 {offsets = [0, 128], sizes = [8, 128], strides = [1, 1]} : vector<8x256xf32> to vector<8x128xf32>
    %118 = arith.addf %71, %117 : vector<8x128xf32>
    %119 = vector.extract_strided_slice %10 {offsets = [16, 0], sizes = [8, 128], strides = [1, 1]} : vector<64x128xf32> to vector<8x128xf32>
    %cst_48 = arith.constant dense<0.000000e+00> : vector<8x128xf32>
    %120 = tpu.matmul %92, %0, %cst_48 {dimension_numbers = #tpu.dot_dimension_numbers<[1], [0], [0], [1], [0, 0, 1, 1], [], []>} : vector<8x32xf32>, vector<32x128xf32>, vector<8x128xf32> -> vector<8x128xf32>
    %121 = arith.addf %119, %120 : vector<8x128xf32>
    %122 = arith.negf %121 : vector<8x128xf32>
    %123 = math.exp %122 : vector<8x128xf32>
    %cst_49 = arith.constant 1.000000e+00 : f32
    %124 = vector.broadcast %cst_49 : f32 to vector<8x128xf32>
    %125 = arith.addf %124, %123 : vector<8x128xf32>
    %126 = arith.divf %124, %125 : vector<8x128xf32>
    %127 = vector.extract_strided_slice %126 {offsets = [0, 0], sizes = [8, 32], strides = [1, 1]} : vector<8x128xf32> to vector<8x32xf32>
    %128 = vector.extract_strided_slice %126 {offsets = [0, 32], sizes = [8, 32], strides = [1, 1]} : vector<8x128xf32> to vector<8x32xf32>
    %129 = vector.extract_strided_slice %126 {offsets = [0, 64], sizes = [8, 32], strides = [1, 1]} : vector<8x128xf32> to vector<8x32xf32>
    %cst_50 = arith.constant 2.000000e+00 : f32
    %130 = vector.broadcast %cst_50 : f32 to vector<8x32xf32>
    %131 = arith.mulf %130, %129 : vector<8x32xf32>
    %cst_51 = arith.constant 1.000000e+00 : f32
    %132 = vector.broadcast %cst_51 : f32 to vector<8x32xf32>
    %133 = arith.subf %131, %132 : vector<8x32xf32>
    %134 = vector.extract_strided_slice %126 {offsets = [0, 96], sizes = [8, 32], strides = [1, 1]} : vector<8x128xf32> to vector<8x32xf32>
    %135 = arith.mulf %128, %90 : vector<8x32xf32>
    %136 = arith.mulf %127, %133 : vector<8x32xf32>
    %137 = arith.addf %135, %136 : vector<8x32xf32>
    %138 = math.tanh %137 : vector<8x32xf32>
    %139 = arith.mulf %134, %138 : vector<8x32xf32>
    %cst_52 = arith.constant dense<0.000000e+00> : vector<8x128xf32>
    %140 = tpu.matmul %139, %1, %cst_52 {dimension_numbers = #tpu.dot_dimension_numbers<[1], [0], [0], [1], [0, 0, 1, 1], [], []>} : vector<8x32xf32>, vector<32x128xf32>, vector<8x128xf32> -> vector<8x128xf32>
    %141 = arith.addf %140, %116 : vector<8x128xf32>
    %142 = arith.negf %141 : vector<8x128xf32>
    %143 = math.exp %142 : vector<8x128xf32>
    %cst_53 = arith.constant 1.000000e+00 : f32
    %144 = vector.broadcast %cst_53 : f32 to vector<8x128xf32>
    %145 = arith.addf %144, %143 : vector<8x128xf32>
    %146 = arith.divf %144, %145 : vector<8x128xf32>
    %147 = vector.extract_strided_slice %146 {offsets = [0, 0], sizes = [8, 32], strides = [1, 1]} : vector<8x128xf32> to vector<8x32xf32>
    %148 = vector.extract_strided_slice %146 {offsets = [0, 32], sizes = [8, 32], strides = [1, 1]} : vector<8x128xf32> to vector<8x32xf32>
    %149 = vector.extract_strided_slice %146 {offsets = [0, 64], sizes = [8, 32], strides = [1, 1]} : vector<8x128xf32> to vector<8x32xf32>
    %cst_54 = arith.constant 2.000000e+00 : f32
    %150 = vector.broadcast %cst_54 : f32 to vector<8x32xf32>
    %151 = arith.mulf %150, %149 : vector<8x32xf32>
    %cst_55 = arith.constant 1.000000e+00 : f32
    %152 = vector.broadcast %cst_55 : f32 to vector<8x32xf32>
    %153 = arith.subf %151, %152 : vector<8x32xf32>
    %154 = vector.extract_strided_slice %146 {offsets = [0, 96], sizes = [8, 32], strides = [1, 1]} : vector<8x128xf32> to vector<8x32xf32>
    %155 = arith.mulf %148, %110 : vector<8x32xf32>
    %156 = arith.mulf %147, %153 : vector<8x32xf32>
    %157 = arith.addf %155, %156 : vector<8x32xf32>
    %158 = math.tanh %157 : vector<8x32xf32>
    %159 = arith.mulf %154, %158 : vector<8x32xf32>
    %c64 = arith.constant 64 : index
    %c0_56 = arith.constant 0 : index
    %160 = vector.load %arg9[%c64, %c0_56] : memref<256x256xf32, #tpu.memory_space<vmem>>, vector<32x256xf32>
    %cst_57 = arith.constant dense<0.000000e+00> : vector<8x256xf32>
    %161 = tpu.matmul %159, %160, %cst_57 {dimension_numbers = #tpu.dot_dimension_numbers<[1], [0], [0], [1], [0, 0, 1, 1], [], []>} : vector<8x32xf32>, vector<32x256xf32>, vector<8x256xf32> -> vector<8x256xf32>
    %162 = vector.extract_strided_slice %161 {offsets = [0, 0], sizes = [8, 128], strides = [1, 1]} : vector<8x256xf32> to vector<8x128xf32>
    %163 = arith.addf %162, %4 : vector<8x128xf32>
    %164 = vector.extract_strided_slice %161 {offsets = [0, 128], sizes = [8, 128], strides = [1, 1]} : vector<8x256xf32> to vector<8x128xf32>
    %165 = arith.addf %118, %164 : vector<8x128xf32>
    %166 = vector.extract_strided_slice %10 {offsets = [24, 0], sizes = [8, 128], strides = [1, 1]} : vector<64x128xf32> to vector<8x128xf32>
    %cst_58 = arith.constant dense<0.000000e+00> : vector<8x128xf32>
    %167 = tpu.matmul %139, %0, %cst_58 {dimension_numbers = #tpu.dot_dimension_numbers<[1], [0], [0], [1], [0, 0, 1, 1], [], []>} : vector<8x32xf32>, vector<32x128xf32>, vector<8x128xf32> -> vector<8x128xf32>
    %168 = arith.addf %166, %167 : vector<8x128xf32>
    %169 = arith.negf %168 : vector<8x128xf32>
    %170 = math.exp %169 : vector<8x128xf32>
    %cst_59 = arith.constant 1.000000e+00 : f32
    %171 = vector.broadcast %cst_59 : f32 to vector<8x128xf32>
    %172 = arith.addf %171, %170 : vector<8x128xf32>
    %173 = arith.divf %171, %172 : vector<8x128xf32>
    %174 = vector.extract_strided_slice %173 {offsets = [0, 0], sizes = [8, 32], strides = [1, 1]} : vector<8x128xf32> to vector<8x32xf32>
    %175 = vector.extract_strided_slice %173 {offsets = [0, 32], sizes = [8, 32], strides = [1, 1]} : vector<8x128xf32> to vector<8x32xf32>
    %176 = vector.extract_strided_slice %173 {offsets = [0, 64], sizes = [8, 32], strides = [1, 1]} : vector<8x128xf32> to vector<8x32xf32>
    %cst_60 = arith.constant 2.000000e+00 : f32
    %177 = vector.broadcast %cst_60 : f32 to vector<8x32xf32>
    %178 = arith.mulf %177, %176 : vector<8x32xf32>
    %cst_61 = arith.constant 1.000000e+00 : f32
    %179 = vector.broadcast %cst_61 : f32 to vector<8x32xf32>
    %180 = arith.subf %178, %179 : vector<8x32xf32>
    %181 = vector.extract_strided_slice %173 {offsets = [0, 96], sizes = [8, 32], strides = [1, 1]} : vector<8x128xf32> to vector<8x32xf32>
    %182 = arith.mulf %175, %137 : vector<8x32xf32>
    %183 = arith.mulf %174, %180 : vector<8x32xf32>
    %184 = arith.addf %182, %183 : vector<8x32xf32>
    %185 = math.tanh %184 : vector<8x32xf32>
    %186 = arith.mulf %181, %185 : vector<8x32xf32>
    %cst_62 = arith.constant dense<0.000000e+00> : vector<8x128xf32>
    %187 = tpu.matmul %186, %1, %cst_62 {dimension_numbers = #tpu.dot_dimension_numbers<[1], [0], [0], [1], [0, 0, 1, 1], [], []>} : vector<8x32xf32>, vector<32x128xf32>, vector<8x128xf32> -> vector<8x128xf32>
    %188 = arith.addf %187, %163 : vector<8x128xf32>
    %189 = arith.negf %188 : vector<8x128xf32>
    %190 = math.exp %189 : vector<8x128xf32>
    %cst_63 = arith.constant 1.000000e+00 : f32
    %191 = vector.broadcast %cst_63 : f32 to vector<8x128xf32>
    %192 = arith.addf %191, %190 : vector<8x128xf32>
    %193 = arith.divf %191, %192 : vector<8x128xf32>
    %194 = vector.extract_strided_slice %193 {offsets = [0, 0], sizes = [8, 32], strides = [1, 1]} : vector<8x128xf32> to vector<8x32xf32>
    %195 = vector.extract_strided_slice %193 {offsets = [0, 32], sizes = [8, 32], strides = [1, 1]} : vector<8x128xf32> to vector<8x32xf32>
    %196 = vector.extract_strided_slice %193 {offsets = [0, 64], sizes = [8, 32], strides = [1, 1]} : vector<8x128xf32> to vector<8x32xf32>
    %cst_64 = arith.constant 2.000000e+00 : f32
    %197 = vector.broadcast %cst_64 : f32 to vector<8x32xf32>
    %198 = arith.mulf %197, %196 : vector<8x32xf32>
    %cst_65 = arith.constant 1.000000e+00 : f32
    %199 = vector.broadcast %cst_65 : f32 to vector<8x32xf32>
    %200 = arith.subf %198, %199 : vector<8x32xf32>
    %201 = vector.extract_strided_slice %193 {offsets = [0, 96], sizes = [8, 32], strides = [1, 1]} : vector<8x128xf32> to vector<8x32xf32>
    %202 = arith.mulf %195, %157 : vector<8x32xf32>
    %203 = arith.mulf %194, %200 : vector<8x32xf32>
    %204 = arith.addf %202, %203 : vector<8x32xf32>
    %205 = math.tanh %204 : vector<8x32xf32>
    %206 = arith.mulf %201, %205 : vector<8x32xf32>
    %c96 = arith.constant 96 : index
    %c0_66 = arith.constant 0 : index
    %207 = vector.load %arg9[%c96, %c0_66] : memref<256x256xf32, #tpu.memory_space<vmem>>, vector<32x256xf32>
    %cst_67 = arith.constant dense<0.000000e+00> : vector<8x256xf32>
    %208 = tpu.matmul %206, %207, %cst_67 {dimension_numbers = #tpu.dot_dimension_numbers<[1], [0], [0], [1], [0, 0, 1, 1], [], []>} : vector<8x32xf32>, vector<32x256xf32>, vector<8x256xf32> -> vector<8x256xf32>
    %209 = vector.extract_strided_slice %208 {offsets = [0, 0], sizes = [8, 128], strides = [1, 1]} : vector<8x256xf32> to vector<8x128xf32>
    %210 = arith.addf %209, %4 : vector<8x128xf32>
    %211 = vector.extract_strided_slice %208 {offsets = [0, 128], sizes = [8, 128], strides = [1, 1]} : vector<8x256xf32> to vector<8x128xf32>
    %212 = arith.addf %165, %211 : vector<8x128xf32>
    %213 = vector.extract_strided_slice %10 {offsets = [32, 0], sizes = [8, 128], strides = [1, 1]} : vector<64x128xf32> to vector<8x128xf32>
    %cst_68 = arith.constant dense<0.000000e+00> : vector<8x128xf32>
    %214 = tpu.matmul %186, %0, %cst_68 {dimension_numbers = #tpu.dot_dimension_numbers<[1], [0], [0], [1], [0, 0, 1, 1], [], []>} : vector<8x32xf32>, vector<32x128xf32>, vector<8x128xf32> -> vector<8x128xf32>
    %215 = arith.addf %213, %214 : vector<8x128xf32>
    %216 = arith.negf %215 : vector<8x128xf32>
    %217 = math.exp %216 : vector<8x128xf32>
    %cst_69 = arith.constant 1.000000e+00 : f32
    %218 = vector.broadcast %cst_69 : f32 to vector<8x128xf32>
    %219 = arith.addf %218, %217 : vector<8x128xf32>
    %220 = arith.divf %218, %219 : vector<8x128xf32>
    %221 = vector.extract_strided_slice %220 {offsets = [0, 0], sizes = [8, 32], strides = [1, 1]} : vector<8x128xf32> to vector<8x32xf32>
    %222 = vector.extract_strided_slice %220 {offsets = [0, 32], sizes = [8, 32], strides = [1, 1]} : vector<8x128xf32> to vector<8x32xf32>
    %223 = vector.extract_strided_slice %220 {offsets = [0, 64], sizes = [8, 32], strides = [1, 1]} : vector<8x128xf32> to vector<8x32xf32>
    %cst_70 = arith.constant 2.000000e+00 : f32
    %224 = vector.broadcast %cst_70 : f32 to vector<8x32xf32>
    %225 = arith.mulf %224, %223 : vector<8x32xf32>
    %cst_71 = arith.constant 1.000000e+00 : f32
    %226 = vector.broadcast %cst_71 : f32 to vector<8x32xf32>
    %227 = arith.subf %225, %226 : vector<8x32xf32>
    %228 = vector.extract_strided_slice %220 {offsets = [0, 96], sizes = [8, 32], strides = [1, 1]} : vector<8x128xf32> to vector<8x32xf32>
    %229 = arith.mulf %222, %184 : vector<8x32xf32>
    %230 = arith.mulf %221, %227 : vector<8x32xf32>
    %231 = arith.addf %229, %230 : vector<8x32xf32>
    %232 = math.tanh %231 : vector<8x32xf32>
    %233 = arith.mulf %228, %232 : vector<8x32xf32>
    %cst_72 = arith.constant dense<0.000000e+00> : vector<8x128xf32>
    %234 = tpu.matmul %233, %1, %cst_72 {dimension_numbers = #tpu.dot_dimension_numbers<[1], [0], [0], [1], [0, 0, 1, 1], [], []>} : vector<8x32xf32>, vector<32x128xf32>, vector<8x128xf32> -> vector<8x128xf32>
    %235 = arith.addf %234, %210 : vector<8x128xf32>
    %236 = arith.negf %235 : vector<8x128xf32>
    %237 = math.exp %236 : vector<8x128xf32>
    %cst_73 = arith.constant 1.000000e+00 : f32
    %238 = vector.broadcast %cst_73 : f32 to vector<8x128xf32>
    %239 = arith.addf %238, %237 : vector<8x128xf32>
    %240 = arith.divf %238, %239 : vector<8x128xf32>
    %241 = vector.extract_strided_slice %240 {offsets = [0, 0], sizes = [8, 32], strides = [1, 1]} : vector<8x128xf32> to vector<8x32xf32>
    %242 = vector.extract_strided_slice %240 {offsets = [0, 32], sizes = [8, 32], strides = [1, 1]} : vector<8x128xf32> to vector<8x32xf32>
    %243 = vector.extract_strided_slice %240 {offsets = [0, 64], sizes = [8, 32], strides = [1, 1]} : vector<8x128xf32> to vector<8x32xf32>
    %cst_74 = arith.constant 2.000000e+00 : f32
    %244 = vector.broadcast %cst_74 : f32 to vector<8x32xf32>
    %245 = arith.mulf %244, %243 : vector<8x32xf32>
    %cst_75 = arith.constant 1.000000e+00 : f32
    %246 = vector.broadcast %cst_75 : f32 to vector<8x32xf32>
    %247 = arith.subf %245, %246 : vector<8x32xf32>
    %248 = vector.extract_strided_slice %240 {offsets = [0, 96], sizes = [8, 32], strides = [1, 1]} : vector<8x128xf32> to vector<8x32xf32>
    %249 = arith.mulf %242, %204 : vector<8x32xf32>
    %250 = arith.mulf %241, %247 : vector<8x32xf32>
    %251 = arith.addf %249, %250 : vector<8x32xf32>
    %252 = math.tanh %251 : vector<8x32xf32>
    %253 = arith.mulf %248, %252 : vector<8x32xf32>
    %c128 = arith.constant 128 : index
    %c0_76 = arith.constant 0 : index
    %254 = vector.load %arg9[%c128, %c0_76] : memref<256x256xf32, #tpu.memory_space<vmem>>, vector<32x256xf32>
    %cst_77 = arith.constant dense<0.000000e+00> : vector<8x256xf32>
    %255 = tpu.matmul %253, %254, %cst_77 {dimension_numbers = #tpu.dot_dimension_numbers<[1], [0], [0], [1], [0, 0, 1, 1], [], []>} : vector<8x32xf32>, vector<32x256xf32>, vector<8x256xf32> -> vector<8x256xf32>
    %256 = vector.extract_strided_slice %255 {offsets = [0, 0], sizes = [8, 128], strides = [1, 1]} : vector<8x256xf32> to vector<8x128xf32>
    %257 = arith.addf %256, %4 : vector<8x128xf32>
    %258 = vector.extract_strided_slice %255 {offsets = [0, 128], sizes = [8, 128], strides = [1, 1]} : vector<8x256xf32> to vector<8x128xf32>
    %259 = arith.addf %212, %258 : vector<8x128xf32>
    %260 = vector.extract_strided_slice %10 {offsets = [40, 0], sizes = [8, 128], strides = [1, 1]} : vector<64x128xf32> to vector<8x128xf32>
    %cst_78 = arith.constant dense<0.000000e+00> : vector<8x128xf32>
    %261 = tpu.matmul %233, %0, %cst_78 {dimension_numbers = #tpu.dot_dimension_numbers<[1], [0], [0], [1], [0, 0, 1, 1], [], []>} : vector<8x32xf32>, vector<32x128xf32>, vector<8x128xf32> -> vector<8x128xf32>
    %262 = arith.addf %260, %261 : vector<8x128xf32>
    %263 = arith.negf %262 : vector<8x128xf32>
    %264 = math.exp %263 : vector<8x128xf32>
    %cst_79 = arith.constant 1.000000e+00 : f32
    %265 = vector.broadcast %cst_79 : f32 to vector<8x128xf32>
    %266 = arith.addf %265, %264 : vector<8x128xf32>
    %267 = arith.divf %265, %266 : vector<8x128xf32>
    %268 = vector.extract_strided_slice %267 {offsets = [0, 0], sizes = [8, 32], strides = [1, 1]} : vector<8x128xf32> to vector<8x32xf32>
    %269 = vector.extract_strided_slice %267 {offsets = [0, 32], sizes = [8, 32], strides = [1, 1]} : vector<8x128xf32> to vector<8x32xf32>
    %270 = vector.extract_strided_slice %267 {offsets = [0, 64], sizes = [8, 32], strides = [1, 1]} : vector<8x128xf32> to vector<8x32xf32>
    %cst_80 = arith.constant 2.000000e+00 : f32
    %271 = vector.broadcast %cst_80 : f32 to vector<8x32xf32>
    %272 = arith.mulf %271, %270 : vector<8x32xf32>
    %cst_81 = arith.constant 1.000000e+00 : f32
    %273 = vector.broadcast %cst_81 : f32 to vector<8x32xf32>
    %274 = arith.subf %272, %273 : vector<8x32xf32>
    %275 = vector.extract_strided_slice %267 {offsets = [0, 96], sizes = [8, 32], strides = [1, 1]} : vector<8x128xf32> to vector<8x32xf32>
    %276 = arith.mulf %269, %231 : vector<8x32xf32>
    %277 = arith.mulf %268, %274 : vector<8x32xf32>
    %278 = arith.addf %276, %277 : vector<8x32xf32>
    %279 = math.tanh %278 : vector<8x32xf32>
    %280 = arith.mulf %275, %279 : vector<8x32xf32>
    %cst_82 = arith.constant dense<0.000000e+00> : vector<8x128xf32>
    %281 = tpu.matmul %280, %1, %cst_82 {dimension_numbers = #tpu.dot_dimension_numbers<[1], [0], [0], [1], [0, 0, 1, 1], [], []>} : vector<8x32xf32>, vector<32x128xf32>, vector<8x128xf32> -> vector<8x128xf32>
    %282 = arith.addf %281, %257 : vector<8x128xf32>
    %283 = arith.negf %282 : vector<8x128xf32>
    %284 = math.exp %283 : vector<8x128xf32>
    %cst_83 = arith.constant 1.000000e+00 : f32
    %285 = vector.broadcast %cst_83 : f32 to vector<8x128xf32>
    %286 = arith.addf %285, %284 : vector<8x128xf32>
    %287 = arith.divf %285, %286 : vector<8x128xf32>
    %288 = vector.extract_strided_slice %287 {offsets = [0, 0], sizes = [8, 32], strides = [1, 1]} : vector<8x128xf32> to vector<8x32xf32>
    %289 = vector.extract_strided_slice %287 {offsets = [0, 32], sizes = [8, 32], strides = [1, 1]} : vector<8x128xf32> to vector<8x32xf32>
    %290 = vector.extract_strided_slice %287 {offsets = [0, 64], sizes = [8, 32], strides = [1, 1]} : vector<8x128xf32> to vector<8x32xf32>
    %cst_84 = arith.constant 2.000000e+00 : f32
    %291 = vector.broadcast %cst_84 : f32 to vector<8x32xf32>
    %292 = arith.mulf %291, %290 : vector<8x32xf32>
    %cst_85 = arith.constant 1.000000e+00 : f32
    %293 = vector.broadcast %cst_85 : f32 to vector<8x32xf32>
    %294 = arith.subf %292, %293 : vector<8x32xf32>
    %295 = vector.extract_strided_slice %287 {offsets = [0, 96], sizes = [8, 32], strides = [1, 1]} : vector<8x128xf32> to vector<8x32xf32>
    %296 = arith.mulf %289, %251 : vector<8x32xf32>
    %297 = arith.mulf %288, %294 : vector<8x32xf32>
    %298 = arith.addf %296, %297 : vector<8x32xf32>
    %299 = math.tanh %298 : vector<8x32xf32>
    %300 = arith.mulf %295, %299 : vector<8x32xf32>
    %c160 = arith.constant 160 : index
    %c0_86 = arith.constant 0 : index
    %301 = vector.load %arg9[%c160, %c0_86] : memref<256x256xf32, #tpu.memory_space<vmem>>, vector<32x256xf32>
    %cst_87 = arith.constant dense<0.000000e+00> : vector<8x256xf32>
    %302 = tpu.matmul %300, %301, %cst_87 {dimension_numbers = #tpu.dot_dimension_numbers<[1], [0], [0], [1], [0, 0, 1, 1], [], []>} : vector<8x32xf32>, vector<32x256xf32>, vector<8x256xf32> -> vector<8x256xf32>
    %303 = vector.extract_strided_slice %302 {offsets = [0, 0], sizes = [8, 128], strides = [1, 1]} : vector<8x256xf32> to vector<8x128xf32>
    %304 = arith.addf %303, %4 : vector<8x128xf32>
    %305 = vector.extract_strided_slice %302 {offsets = [0, 128], sizes = [8, 128], strides = [1, 1]} : vector<8x256xf32> to vector<8x128xf32>
    %306 = arith.addf %259, %305 : vector<8x128xf32>
    %307 = vector.extract_strided_slice %10 {offsets = [48, 0], sizes = [8, 128], strides = [1, 1]} : vector<64x128xf32> to vector<8x128xf32>
    %cst_88 = arith.constant dense<0.000000e+00> : vector<8x128xf32>
    %308 = tpu.matmul %280, %0, %cst_88 {dimension_numbers = #tpu.dot_dimension_numbers<[1], [0], [0], [1], [0, 0, 1, 1], [], []>} : vector<8x32xf32>, vector<32x128xf32>, vector<8x128xf32> -> vector<8x128xf32>
    %309 = arith.addf %307, %308 : vector<8x128xf32>
    %310 = arith.negf %309 : vector<8x128xf32>
    %311 = math.exp %310 : vector<8x128xf32>
    %cst_89 = arith.constant 1.000000e+00 : f32
    %312 = vector.broadcast %cst_89 : f32 to vector<8x128xf32>
    %313 = arith.addf %312, %311 : vector<8x128xf32>
    %314 = arith.divf %312, %313 : vector<8x128xf32>
    %315 = vector.extract_strided_slice %314 {offsets = [0, 0], sizes = [8, 32], strides = [1, 1]} : vector<8x128xf32> to vector<8x32xf32>
    %316 = vector.extract_strided_slice %314 {offsets = [0, 32], sizes = [8, 32], strides = [1, 1]} : vector<8x128xf32> to vector<8x32xf32>
    %317 = vector.extract_strided_slice %314 {offsets = [0, 64], sizes = [8, 32], strides = [1, 1]} : vector<8x128xf32> to vector<8x32xf32>
    %cst_90 = arith.constant 2.000000e+00 : f32
    %318 = vector.broadcast %cst_90 : f32 to vector<8x32xf32>
    %319 = arith.mulf %318, %317 : vector<8x32xf32>
    %cst_91 = arith.constant 1.000000e+00 : f32
    %320 = vector.broadcast %cst_91 : f32 to vector<8x32xf32>
    %321 = arith.subf %319, %320 : vector<8x32xf32>
    %322 = vector.extract_strided_slice %314 {offsets = [0, 96], sizes = [8, 32], strides = [1, 1]} : vector<8x128xf32> to vector<8x32xf32>
    %323 = arith.mulf %316, %278 : vector<8x32xf32>
    %324 = arith.mulf %315, %321 : vector<8x32xf32>
    %325 = arith.addf %323, %324 : vector<8x32xf32>
    %326 = math.tanh %325 : vector<8x32xf32>
    %327 = arith.mulf %322, %326 : vector<8x32xf32>
    %cst_92 = arith.constant dense<0.000000e+00> : vector<8x128xf32>
    %328 = tpu.matmul %327, %1, %cst_92 {dimension_numbers = #tpu.dot_dimension_numbers<[1], [0], [0], [1], [0, 0, 1, 1], [], []>} : vector<8x32xf32>, vector<32x128xf32>, vector<8x128xf32> -> vector<8x128xf32>
    %329 = arith.addf %328, %304 : vector<8x128xf32>
    %330 = arith.negf %329 : vector<8x128xf32>
    %331 = math.exp %330 : vector<8x128xf32>
    %cst_93 = arith.constant 1.000000e+00 : f32
    %332 = vector.broadcast %cst_93 : f32 to vector<8x128xf32>
    %333 = arith.addf %332, %331 : vector<8x128xf32>
    %334 = arith.divf %332, %333 : vector<8x128xf32>
    %335 = vector.extract_strided_slice %334 {offsets = [0, 0], sizes = [8, 32], strides = [1, 1]} : vector<8x128xf32> to vector<8x32xf32>
    %336 = vector.extract_strided_slice %334 {offsets = [0, 32], sizes = [8, 32], strides = [1, 1]} : vector<8x128xf32> to vector<8x32xf32>
    %337 = vector.extract_strided_slice %334 {offsets = [0, 64], sizes = [8, 32], strides = [1, 1]} : vector<8x128xf32> to vector<8x32xf32>
    %cst_94 = arith.constant 2.000000e+00 : f32
    %338 = vector.broadcast %cst_94 : f32 to vector<8x32xf32>
    %339 = arith.mulf %338, %337 : vector<8x32xf32>
    %cst_95 = arith.constant 1.000000e+00 : f32
    %340 = vector.broadcast %cst_95 : f32 to vector<8x32xf32>
    %341 = arith.subf %339, %340 : vector<8x32xf32>
    %342 = vector.extract_strided_slice %334 {offsets = [0, 96], sizes = [8, 32], strides = [1, 1]} : vector<8x128xf32> to vector<8x32xf32>
    %343 = arith.mulf %336, %298 : vector<8x32xf32>
    %344 = arith.mulf %335, %341 : vector<8x32xf32>
    %345 = arith.addf %343, %344 : vector<8x32xf32>
    %346 = math.tanh %345 : vector<8x32xf32>
    %347 = arith.mulf %342, %346 : vector<8x32xf32>
    %c192 = arith.constant 192 : index
    %c0_96 = arith.constant 0 : index
    %348 = vector.load %arg9[%c192, %c0_96] : memref<256x256xf32, #tpu.memory_space<vmem>>, vector<32x256xf32>
    %cst_97 = arith.constant dense<0.000000e+00> : vector<8x256xf32>
    %349 = tpu.matmul %347, %348, %cst_97 {dimension_numbers = #tpu.dot_dimension_numbers<[1], [0], [0], [1], [0, 0, 1, 1], [], []>} : vector<8x32xf32>, vector<32x256xf32>, vector<8x256xf32> -> vector<8x256xf32>
    %350 = vector.extract_strided_slice %349 {offsets = [0, 0], sizes = [8, 128], strides = [1, 1]} : vector<8x256xf32> to vector<8x128xf32>
    %351 = arith.addf %350, %4 : vector<8x128xf32>
    %352 = vector.extract_strided_slice %349 {offsets = [0, 128], sizes = [8, 128], strides = [1, 1]} : vector<8x256xf32> to vector<8x128xf32>
    %353 = arith.addf %306, %352 : vector<8x128xf32>
    %354 = vector.extract_strided_slice %10 {offsets = [56, 0], sizes = [8, 128], strides = [1, 1]} : vector<64x128xf32> to vector<8x128xf32>
    %cst_98 = arith.constant dense<0.000000e+00> : vector<8x128xf32>
    %355 = tpu.matmul %327, %0, %cst_98 {dimension_numbers = #tpu.dot_dimension_numbers<[1], [0], [0], [1], [0, 0, 1, 1], [], []>} : vector<8x32xf32>, vector<32x128xf32>, vector<8x128xf32> -> vector<8x128xf32>
    %356 = arith.addf %354, %355 : vector<8x128xf32>
    %357 = arith.negf %356 : vector<8x128xf32>
    %358 = math.exp %357 : vector<8x128xf32>
    %cst_99 = arith.constant 1.000000e+00 : f32
    %359 = vector.broadcast %cst_99 : f32 to vector<8x128xf32>
    %360 = arith.addf %359, %358 : vector<8x128xf32>
    %361 = arith.divf %359, %360 : vector<8x128xf32>
    %362 = vector.extract_strided_slice %361 {offsets = [0, 0], sizes = [8, 32], strides = [1, 1]} : vector<8x128xf32> to vector<8x32xf32>
    %363 = vector.extract_strided_slice %361 {offsets = [0, 32], sizes = [8, 32], strides = [1, 1]} : vector<8x128xf32> to vector<8x32xf32>
    %364 = vector.extract_strided_slice %361 {offsets = [0, 64], sizes = [8, 32], strides = [1, 1]} : vector<8x128xf32> to vector<8x32xf32>
    %cst_100 = arith.constant 2.000000e+00 : f32
    %365 = vector.broadcast %cst_100 : f32 to vector<8x32xf32>
    %366 = arith.mulf %365, %364 : vector<8x32xf32>
    %cst_101 = arith.constant 1.000000e+00 : f32
    %367 = vector.broadcast %cst_101 : f32 to vector<8x32xf32>
    %368 = arith.subf %366, %367 : vector<8x32xf32>
    %369 = vector.extract_strided_slice %361 {offsets = [0, 96], sizes = [8, 32], strides = [1, 1]} : vector<8x128xf32> to vector<8x32xf32>
    %370 = arith.mulf %363, %325 : vector<8x32xf32>
    %371 = arith.mulf %362, %368 : vector<8x32xf32>
    %372 = arith.addf %370, %371 : vector<8x32xf32>
    %373 = math.tanh %372 : vector<8x32xf32>
    %374 = arith.mulf %369, %373 : vector<8x32xf32>
    %cst_102 = arith.constant dense<0.000000e+00> : vector<8x128xf32>
    %375 = tpu.matmul %374, %1, %cst_102 {dimension_numbers = #tpu.dot_dimension_numbers<[1], [0], [0], [1], [0, 0, 1, 1], [], []>} : vector<8x32xf32>, vector<32x128xf32>, vector<8x128xf32> -> vector<8x128xf32>
    %376 = arith.addf %375, %351 : vector<8x128xf32>
    %377 = arith.negf %376 : vector<8x128xf32>
    %378 = math.exp %377 : vector<8x128xf32>
    %cst_103 = arith.constant 1.000000e+00 : f32
    %379 = vector.broadcast %cst_103 : f32 to vector<8x128xf32>
    %380 = arith.addf %379, %378 : vector<8x128xf32>
    %381 = arith.divf %379, %380 : vector<8x128xf32>
    %382 = vector.extract_strided_slice %381 {offsets = [0, 0], sizes = [8, 32], strides = [1, 1]} : vector<8x128xf32> to vector<8x32xf32>
    %383 = vector.extract_strided_slice %381 {offsets = [0, 32], sizes = [8, 32], strides = [1, 1]} : vector<8x128xf32> to vector<8x32xf32>
    %384 = vector.extract_strided_slice %381 {offsets = [0, 64], sizes = [8, 32], strides = [1, 1]} : vector<8x128xf32> to vector<8x32xf32>
    %cst_104 = arith.constant 2.000000e+00 : f32
    %385 = vector.broadcast %cst_104 : f32 to vector<8x32xf32>
    %386 = arith.mulf %385, %384 : vector<8x32xf32>
    %cst_105 = arith.constant 1.000000e+00 : f32
    %387 = vector.broadcast %cst_105 : f32 to vector<8x32xf32>
    %388 = arith.subf %386, %387 : vector<8x32xf32>
    %389 = vector.extract_strided_slice %381 {offsets = [0, 96], sizes = [8, 32], strides = [1, 1]} : vector<8x128xf32> to vector<8x32xf32>
    %390 = arith.mulf %383, %345 : vector<8x32xf32>
    %391 = arith.mulf %382, %388 : vector<8x32xf32>
    %392 = arith.addf %390, %391 : vector<8x32xf32>
    %393 = math.tanh %392 : vector<8x32xf32>
    %394 = arith.mulf %389, %393 : vector<8x32xf32>
    %c224 = arith.constant 224 : index
    %c0_106 = arith.constant 0 : index
    %395 = vector.load %arg9[%c224, %c0_106] : memref<256x256xf32, #tpu.memory_space<vmem>>, vector<32x256xf32>
    %cst_107 = arith.constant dense<0.000000e+00> : vector<8x256xf32>
    %396 = tpu.matmul %394, %395, %cst_107 {dimension_numbers = #tpu.dot_dimension_numbers<[1], [0], [0], [1], [0, 0, 1, 1], [], []>} : vector<8x32xf32>, vector<32x256xf32>, vector<8x256xf32> -> vector<8x256xf32>
    %397 = vector.extract_strided_slice %396 {offsets = [0, 128], sizes = [8, 128], strides = [1, 1]} : vector<8x256xf32> to vector<8x128xf32>
    %398 = arith.addf %353, %397 : vector<8x128xf32>
    %c0_108 = arith.constant 0 : index
    %c0_109 = arith.constant 0 : index
    %399 = vector.load %arg11[%c0_108, %c0_109] : memref<8x128xf32, #tpu.memory_space<vmem>>, vector<8x128xf32>
    tpu.vector_store %arg11[%c0_108, %c0_109], %398 {strides = array<i32>} : memref<8x128xf32, #tpu.memory_space<vmem>>, vector<8x128xf32>,
    %c0_110 = arith.constant 0 : index
    %c0_111 = arith.constant 0 : index
    %c0_112 = arith.constant 0 : index
    %400 = vector.load %arg12[%c0_110, %c0_111, %c0_112] : memref<2x8x32xf32, #tpu.memory_space<vmem>>, vector<1x8x32xf32>
    %401 = vector.shape_cast %400 : vector<1x8x32xf32> to vector<8x32xf32>
    %402 = vector.shape_cast %374 : vector<8x32xf32> to vector<1x8x32xf32>
    tpu.vector_store %arg12[%c0_110, %c0_111, %c0_112], %402 {strides = array<i32>} : memref<2x8x32xf32, #tpu.memory_space<vmem>>, vector<1x8x32xf32>,
    %c1_113 = arith.constant 1 : index
    %c0_114 = arith.constant 0 : index
    %c0_115 = arith.constant 0 : index
    %403 = vector.load %arg12[%c1_113, %c0_114, %c0_115] : memref<2x8x32xf32, #tpu.memory_space<vmem>>, vector<1x8x32xf32>
    %404 = vector.shape_cast %403 : vector<1x8x32xf32> to vector<8x32xf32>
    %405 = vector.shape_cast %394 : vector<8x32xf32> to vector<1x8x32xf32>
    tpu.vector_store %arg12[%c1_113, %c0_114, %c0_115], %405 {strides = array<i32>} : memref<2x8x32xf32, #tpu.memory_space<vmem>>, vector<1x8x32xf32>,
    %c0_116 = arith.constant 0 : index
    %c0_117 = arith.constant 0 : index
    %c0_118 = arith.constant 0 : index
    %406 = vector.load %arg13[%c0_116, %c0_117, %c0_118] : memref<2x8x32xf32, #tpu.memory_space<vmem>>, vector<1x8x32xf32>
    %407 = vector.shape_cast %406 : vector<1x8x32xf32> to vector<8x32xf32>
    %408 = vector.shape_cast %372 : vector<8x32xf32> to vector<1x8x32xf32>
    tpu.vector_store %arg13[%c0_116, %c0_117, %c0_118], %408 {strides = array<i32>} : memref<2x8x32xf32, #tpu.memory_space<vmem>>, vector<1x8x32xf32>,
    %c1_119 = arith.constant 1 : index
    %c0_120 = arith.constant 0 : index
    %c0_121 = arith.constant 0 : index
    %409 = vector.load %arg13[%c1_119, %c0_120, %c0_121] : memref<2x8x32xf32, #tpu.memory_space<vmem>>, vector<1x8x32xf32>
    %410 = vector.shape_cast %409 : vector<1x8x32xf32> to vector<8x32xf32>
    %411 = vector.shape_cast %392 : vector<8x32xf32> to vector<1x8x32xf32>
    tpu.vector_store %arg13[%c1_119, %c0_120, %c0_121], %411 {strides = array<i32>} : memref<2x8x32xf32, #tpu.memory_space<vmem>>, vector<1x8x32xf32>,
    return
  }
}

</mosaic_0001>

<bundles_post_ra>
// kernel: tpu_custom_call.1
= control target key start
LH: loop header
LB: loop body
LE: loop exit
PB: predicated region body
PF: predicated region fallthrough
CT: control target
= control target key end

     0   :  { %19 = vsyncpa [#allocation3], 0  ;;  %s3978_s0 = inlined_call_operand.vmem [shape: f32[64,10], index: 0, kind: input, shape index: {}]   ;;  %s3979_s1 = inlined_call_operand.vmem [shape: f32[2,8,32], index: 1, kind: input, shape index: {}]   ;;  %s3980_s2 = inlined_call_operand.hbm [shape: f32[2,8,32], index: 2, kind: input, shape index: {}]   ;;  %s3981_s3 = inlined_call_operand.hbm [shape: f32[10,128], index: 3, kind: input, shape index: {}]   ;;  %s3982_s4 = inlined_call_operand.vmem [shape: f32[32,128], index: 4, kind: input, shape index: {}]   ;;  %s3983_s5 = inlined_call_operand.vmem [shape: f32[1,128], index: 5, kind: input, shape index: {}]   ;;  %s3984_s6 = inlined_call_operand.vmem [shape: f32[32,128], index: 6, kind: input, shape index: {}]   ;;  %s3985_s7 = inlined_call_operand.hbm [shape: f32[32,128], index: 7, kind: input, shape index: {}]   ;;  %s3986_s8 = inlined_call_operand.vmem [shape: f32[1,128], index: 8, kind: input, shape index: {}]   ;;  %s3987_s9 = inlined_call_operand.hbm [shape: f32[256,256], index: 9, kind: input, shape index: {}]   ;;  %s3988_s10 = inlined_call_operand.vmem [shape: f32[1,128], index: 10, kind: input, shape index: {}]   ;;  %s3989_s11 = inlined_call_operand.hbm [shape: f32[8,128], index: 11, kind: output, shape index: {0}]   ;;  %s3990_s12 = inlined_call_operand.hbm [shape: f32[2,8,32], index: 12, kind: output, shape index: {1}]   ;;  %s3991_s13 = inlined_call_operand.hbm [shape: f32[2,8,32], index: 13, kind: output, shape index: {2}]  }
   0x1   :  { %20 = vsyncpa [#allocation6], 0 }
   0x2   :  { %21 = vsyncpa [#allocation9], 0 }
   0x3   :  { %22 = vsyncpa [#allocation4], 0 }
   0x4   :  { %23 = vsyncpa [#allocation12], 0  ;;  %s3325_s25 = smov [#allocation5]   ;;  %s3326_s27 = smov [#allocation2]  }
   0x5   :  { %s45_s26 = sshll.u32 %s3325_s25, 4  ;;  %s33_s28 = sshll.u32 %s3326_s27, 4  ;;  %s46_s26 = int_to_ptr.vmem [resolvable:$true] %s45_s26  ;;  %s34_s28 = int_to_ptr.vmem [resolvable:$true] %s33_s28 }
   0x6   :  { %s3183_s29 = scalar_lea.vmem %s46_s26, 256  ;;  %p3188_p1 = scmp.lt.s32.totalorder %s46_s26, %s46_s26 }
   0x7   :  { %p3184_p0 = scmp.ne.s32.totalorder %s46_s26, %s3183_s29  ;;  %p3189_p2 = scmp.lt.s32.totalorder %s3183_s29, %s3183_s29 }
   0x9   :  { %p3190_p3 = por %p3189_p2, %p3188_p1 }
   0xb   :  { %p3191_p4 = pnand %p3190_p3, %p3184_p0 }
   0xd   :  { %3194 = shalt.err (!%p3191_p4)
}
   0xe   :  { %s3327_s30 = smov 128   ;;  %s3328_s14 = smov 8  }
   0xf   :  { %51 = dma.hbm_to_vmem [thread:$0]  %s3981_s3, 256, %s46_s26, [#allocation6], %s3327_s30, %s3327_s30, %s3328_s14  }
  0x10   :  { %s3203_s17 = scalar_lea.vmem %s34_s28, 256  ;;  %p3208_p6 = scmp.lt.s32.totalorder %s34_s28, %s34_s28 }
  0x11   :  { %p3204_p5 = scmp.ne.s32.totalorder %s34_s28, %s3203_s17  ;;  %p3209_p7 = scmp.lt.s32.totalorder %s3203_s17, %s3203_s17 }
  0x13   :  { %p3210_p8 = por %p3209_p7, %p3208_p6 }
  0x15   :  { %p3211_p9 = pnand %p3210_p8, %p3204_p5 }
  0x17   :  { %3214 = shalt.err (!%p3211_p9)
}
  0x18   :  { %39 = dma.hbm_to_vmem [thread:$0]  %s3980_s2, 256, %s34_s28, [#allocation3], %s3327_s30, %s3327_s30, %s3328_s14  }
  0x19   :  { %s3329_s20 = smov [#allocation7]   ;;  %s3330_s22 = smov [#allocation8]  }
  0x1a   :  { %s63_s21 = sshll.u32 %s3329_s20, 4  ;;  %s77_s23 = sshll.u32 %s3330_s22, 4  ;;  %s64_s21 = int_to_ptr.vmem [resolvable:$true] %s63_s21  ;;  %s78_s23 = int_to_ptr.vmem [resolvable:$true] %s77_s23 }
  0x1b   :  { %s3223_s3 = scalar_lea.vmem %s64_s21, 512  ;;  %p3228_p11 = scmp.lt.s32.totalorder %s64_s21, %s64_s21 }
  0x1c   :  { %p3224_p10 = scmp.ne.s32.totalorder %s64_s21, %s3223_s3  ;;  %p3229_p12 = scmp.lt.s32.totalorder %s3223_s3, %s3223_s3 }
  0x1e   :  { %p3230_p13 = por %p3229_p12, %p3228_p11 }
  0x20   :  { %p3231_p0 = pnand %p3230_p13, %p3224_p10 }
  0x22   :  { %3234 = shalt.err (!%p3231_p0)
}
  0x23   :  { %69 = dma.hbm_to_vmem [thread:$0]  %s3985_s7, 512, %s64_s21, [#allocation6], %s3327_s30, %s3327_s30, %s3328_s14  }
  0x24   :  { %s3243_s2 = scalar_lea.vmem %s78_s23, 8192  ;;  %p3248_p2 = scmp.lt.s32.totalorder %s78_s23, %s78_s23 }
  0x25   :  { %p3244_p1 = scmp.ne.s32.totalorder %s78_s23, %s3243_s2  ;;  %p3249_p3 = scmp.lt.s32.totalorder %s3243_s2, %s3243_s2 }
  0x27   :  { %p3250_p4 = por %p3249_p3, %p3248_p2 }
  0x29   :  { %p3251_p5 = pnand %p3250_p4, %p3244_p1 }
  0x2b   :  { %3254 = shalt.err (!%p3251_p5)
}
  0x2c   :  { %s3331_s26 = smov 256   ;;  %s3332_s27 = smov 16  }
  0x2d   :  { %83 = dma.hbm_to_vmem [thread:$0]  %s3987_s9, 8192, %s78_s23, [#allocation9], %s3331_s26, %s3331_s26, %s3332_s27  }
  0x2e   :  { %3315 = dma.done.wait [#allocation3], 256  }
  0x2f   :  { %3316 = vsyncadd [#allocation3], 4294967040 }
  0x30   :  { %3317 = dma.done.wait [#allocation6], 768  }
  0x31   :  { %3318 = vsyncadd [#allocation6], 4294966528 }
  0x32   :  { %3319 = dma.done.wait [#allocation9], 8192  }
  0x33   :  { %3320 = vsyncadd [#allocation9], 4294959104  ;;  %v3333_v0 = vmov 0.0   ;;  %vm3334_vm0 = vmmov 0   ;;  %vm155_vm1 = vcmask 1041408   ;;  %v273_v1 = vld [vmem:[#allocation7 + $0x18] sm:$0xff] }
  0x34   :  { %2866 = vmatprep.subr.mxu1 %v3333_v0  ;;  %2874 = vmatprep.mubr.msk.f32.mxu1 %vm3334_vm0, %v3333_v0  ;;  %v272_v2 = vld [vmem:[#allocation7 + $0x10] sm:$0xff]  ;;  %v122_v3 = vld [vmem:[#allocation5 + $0x8] sm:$0x3]  ;;  %v271_v5 = vld [vmem:[#allocation7 + $0x8] sm:$0xff]  ;;  %vm130_vm2 = vcmask 80896   ;;  %vm274_vm3 = vcmask 261120  }
  0x35   :  { %2867 = vmatpush3.msra.mxu1 %v273_v1  ;;  %v121_v4 = vld [vmem:[#allocation5] sm:$0xff]  ;;  %2850 = vmatprep.subr.msk.mxu0 %vm155_vm1, %v122_v3  ;;  %v113_v6 = vld [vmem:[%s3978_s0] sm:$0xff]  ;;  %v114_v8 = vld [vmem:[%s3978_s0 + $0x8] sm:$0xff]  ;;  %s3336_s29 = smov 32  }
  0x36   :  { %2868 = vmatprep.subr.mxu1 %v3333_v0  ;;  %2851 = vmatpush3.msk.msra.mxu0 %vm155_vm1, %v122_v3  ;;  %v270_v7 = vld [vmem:[#allocation7] sm:$0xff]  ;;  %v2696_v9 = vld [vmem:[%s3979_s1 + $0x8] sm:$0xff]  ;;  %v3451_v10 = vld [vmem:[%s3982_s4 + $0x18] sm:$0xff] }
  0x37   :  { %2869 = vmatpush3.msra.mxu1 %v272_v2  ;;  %2852 = vmatprep.subr.mxu0 %v121_v4  ;;  %v3459_v11 = vld [vmem:[%s3982_s4 + $0x10] sm:$0xff]  ;;  %v3468_v12 = vld [vmem:[%s3982_s4 + $0x8] sm:$0xff]  ;;  %v3476_v13 = vld [vmem:[%s3982_s4] sm:$0xff] }
  0x38   :  { %2870 = vmatprep.subr.mxu1 %v3333_v0  ;;  %2853 = vmatpush3.msra.mxu0 %v121_v4  ;;  %v264_v14 = vld [vmem:[%s3979_s1] sm:$0xff]  ;;  %s3335_s1 = smov 64   ;;  %v3505_v37 = vld [vmem:[%s3984_s6 + $0x18] sm:$0xff]  ;;  %v115_v38 = vld [vmem:[%s3978_s0 + $0x10] sm:$0xff] }
  0x39   :  { %2871 = vmatpush3.msra.mxu1 %v271_v5  ;;  %2854 = vmatprep.mubr.msk.f32.mxu0 %vm130_vm2, %v113_v6  ;;  %v3493_v18 = vld [vmem:[%s3983_s5] ss:$0 sm:$0xff]  ;;  %v116_v39 = vld [vmem:[%s3978_s0 + $0x18] sm:$0xff]  ;;  %v3518_v40 = vld [vmem:[%s3984_s6 + $0x10] sm:$0xff] }
  0x3a   :  { %2872 = vmatprep.subr.mxu1 %v3333_v0  ;;  %2855 = vmatmul.mubr.msk.f32.vlgmr.msra.gmra.mxu0 %vm130_vm2, %v114_v8  ;;  %v265_v30 = vld [vmem:[#allocation2] sm:$0xff]  ;;  %v3528_v42 = vld [vmem:[%s3984_s6 + $0x8] sm:$0xff]  ;;  %v119_v44 = vld [vmem:[%s3978_s0 + $0x30] sm:$0xff] }
  0x3b   :  { %2873 = vmatpush3.msra.mxu1 %v270_v7  ;;  %2888 = vmatprep.subr.mxu0 %v3333_v0  ;;  %v117_v41 = vld [vmem:[%s3978_s0 + $0x20] sm:$0xff]  ;;  %v118_v43 = vld [vmem:[%s3978_s0 + $0x28] sm:$0xff]  ;;  %v120_v46 = vld [vmem:[%s3978_s0 + $0x38] sm:$0xff] }
  0x3c   :  { %2875 = vmatmul.mubr.msk.f32.vlgmr.msra.gmra.mxu1 %vm274_vm3, %v2696_v9  ;;  %2877 = vmatprep.subr.mxu1 %v3333_v0  ;;  %v3542_v45 = vld [vmem:[%s3984_s6] sm:$0xff] }
  0x3d   :  { %2878 = vmatpush3.msra.mxu1 %v3451_v10  ;;  %2885 = vmatprep.mubr.msk.f32.mxu1 %vm3334_vm0, %v3333_v0  ;;  %v3583_v56 = vld [vmem:[%s3986_s8] ss:$0 sm:$0xff] }
  0x3e   :  { %2879 = vmatprep.subr.mxu1 %v3333_v0  ;;  %2889 = vmatpush3.msra.mxu0 %v3505_v37 }
  0x3f   :  { %2880 = vmatpush3.msra.mxu1 %v3459_v11  ;;  %2857 = vmatprep.mubr.msk.f32.mxu0 %vm130_vm2, %v115_v38 }
  0x40   :  { %2881 = vmatprep.subr.mxu1 %v3333_v0  ;;  %2858 = vmatmul.mubr.msk.f32.gmra.mxu0 %vm130_vm2, %v116_v39  ;;  %v565_v39 = vld [vmem:[#allocation8 + $0x18] sm:$0xff] }
  0x41   :  { %2882 = vmatpush3.msra.mxu1 %v3468_v12  ;;  %2890 = vmatprep.subr.mxu0 %v3333_v0 }
  0x42   :  { %2883 = vmatprep.subr.mxu1 %v3333_v0  ;;  %2891 = vmatpush3.msra.mxu0 %v3518_v40 }
  0x43   :  { %2884 = vmatpush3.msra.mxu1 %v3476_v13  ;;  %2860 = vmatprep.mubr.msk.f32.mxu0 %vm130_vm2, %v117_v41  ;;  %v564_v41 = vld [vmem:[#allocation8 + $0x10] sm:$0xff] }
  0x44   :  { %2886 = vmatmul.mubr.msk.f32.vlgmr.msra.gmra.mxu1 %vm274_vm3, %v264_v14  ;;  %2892 = vmatprep.subr.mxu0 %v3333_v0 }
  0x45   :  { %639 = vmatprep.mubr.f32.mxu1 %v3333_v0  ;;  %2893 = vmatpush3.msra.mxu0 %v3528_v42 }
  0x46   :  { %2861 = vmatmul.mubr.msk.f32.gmra.mxu0 %vm130_vm2, %v118_v43  ;;  %2894 = vmatprep.subr.mxu0 %v3333_v0  ;;  %v563_v43 = vld [vmem:[#allocation8 + $0x8] sm:$0xff] }
  0x47   :  { %2863 = vmatprep.mubr.msk.f32.mxu0 %vm130_vm2, %v119_v44  ;;  %2895 = vmatpush3.msra.mxu0 %v3542_v45 }
  0x48   :  { %2899 = vmatprep.subr.mxu0 %v3333_v0 }
  0x4a   :  { %2864 = vmatmul.mubr.msk.f32.gmra.mxu0 %vm130_vm2, %v120_v46 }
  0x4b   :  { %2896 = vmatprep.mubr.msk.f32.mxu0 %vm3334_vm0, %v3333_v0 }
  0xfa   :  { %v3488_v16 = vpop.f32.mrf.mxu0 }
  0xfb   :  { %v231_v63 = vadd.f32 %v3488_v16, %v3493_v18 }
  0xfc   :  { %v3486_v15 = vpop.f32.mrf.mxu1  ;;  %v225_v19 = vpop.f32.mrf.mxu0 }
  0xfd   :  { %v226_v20 = vadd.f32 %v3493_v18, %v225_v19  ;;  %v345_v58 = vadd.f32 %v3583_v56, %v3486_v15 }
  0xfe   :  { %v2876_v17 = vpop.f32.mrf.mxu1 }
  0xff   :  { %v269_v17 = vld [vmem:[#allocation2 + $0x8] sm:$0xff] }
 0x100   :  { %v3570_v51 = vpop.f32.mrf.mxu0 }
 0x102   :  { %v3572_v52 = vpop.f32.mrf.mxu0 }
 0x104   :  { %v424_v21 = vpop.f32.mrf.mxu1 }
 0x105   :  { %v428_v22 = vadd.f32 %v424_v21, %v226_v20 }
 0x106   :  { %v2887_v23 = vpop.f32.mrf.mxu1  ;;  %v3574_v53 = vpop.f32.mrf.mxu0 }
 0x107   :  { %v2700_v24 = vmul.f32 -1.442695, %v428_v22 }
 0x108   :  { %v3576_v54 = vpop.f32.mrf.mxu0 }
 0x109   :  { %3069 = vpow2.f32 %v2700_v24 }
 0x10a   :  { %v3578_v55 = vpop.f32.mrf.mxu0 }
 0x10c   :  { %v3585_v57 = vpop.f32.mrf.mxu0 }
 0x116   :  { %v3070_v25 = vpop.eup %3069 }
 0x117   :  { %v432_v26 = vadd.f32 1.0, %v3070_v25 }
 0x119   :  { %3071 = vrcp.f32 %v432_v26 }
 0x126   :  { %v3072_v27 = vpop.eup %3071 }
 0x127   :  { %v435_v28 = vmul.f32 2.0, %v3072_v27 }
 0x129   :  { %v2701_v29 = vadd.f32 -1.0, %v435_v28 }
 0x12b   :  { %443 = vrot.lane.b32.xlu0 %v2701_v29, %s3335_s1 }
 0x12f   :  { %438 = vrot.lane.b32.xlu0 %v265_v30, %s3336_s29 }
 0x19d   :  { %v444_v31 = vpop.permute.xlu0 %443 }
 0x19e   :  { %v446_v32 = vmul.f32 %v3072_v27, %v444_v31 }
 0x1a0   :  { %448 = vrot.lane.b32.xlu1 %v446_v32, %s3336_s29  ;;  %v569_v32 = vld [vmem:[#allocation8 + $0x38] sm:$0xff] }
 0x1a1   :  { %v439_v33 = vpop.permute.xlu0 %438  ;;  %599 = vmatprep.subr.mxu1 %v569_v32 }
 0x1a2   :  { %v441_v34 = vmul.f32 %v3072_v27, %v439_v33  ;;  %v568_v33 = vld [vmem:[#allocation8 + $0x30] sm:$0xff] }
 0x1a3   :  { %600 = vmatpush1.msra.mxu1 %v568_v33 }
 0x212   :  { %v449_v35 = vpop.permute.xlu1 %448 }
 0x213   :  { %v3499_v36 = vadd.f32 %v449_v35, %v441_v34  ;;  %v567_v34 = vld [vmem:[#allocation8 + $0x28] sm:$0xff]  ;;  %v566_v35 = vld [vmem:[#allocation8 + $0x20] sm:$0xff] }
 0x214   :  { %601 = vmatprep.subr.mxu1 %v567_v34  ;;  %v851_v34 = vld [vmem:[#allocation8 + $0x78] sm:$0xff] }
 0x215   :  { %3073 = vtanh.f32 %v3499_v36  ;;  %602 = vmatpush1.msra.mxu1 %v566_v35  ;;  %v850_v35 = vld [vmem:[#allocation8 + $0x70] sm:$0xff] }
 0x216   :  { %603 = vmatprep.subr.mxu1 %v565_v39  ;;  %v848_v39 = vld [vmem:[#allocation8 + $0x60] sm:$0xff] }
 0x217   :  { %604 = vmatpush1.msra.mxu1 %v564_v41 }
 0x218   :  { %605 = vmatprep.subr.mxu1 %v563_v43  ;;  %v846_v43 = vld [vmem:[#allocation8 + $0x50] sm:$0xff] }
 0x222   :  { %v3074_v47 = vpop.eup %3073 }
 0x223   :  { %454 = vrot.lane.b32.xlu1 %v3074_v47, %s3335_s1 }
 0x295   :  { %v455_v48 = vpop.permute.xlu1 %454 }
 0x296   :  { %v457_v49 = vmul.f32 %v3072_v27, %v455_v48 }
 0x298   :  { %459 = vrot.lane.b32.xlu0 %v457_v49, %s3336_s29 }
 0x30a   :  { %v460_v50 = vpop.permute.xlu0 %459 }
 0x30b   :  { %2897 = vmatmul.mubr.msk.f32.vlgmr.msra.gmra.mxu0 %vm274_vm3, %v460_v50 }
 0x30c   :  { %2900 = vmatpush3.msra.mxu0 %v3451_v10  ;;  %2907 = vmatprep.mubr.msk.f32.mxu0 %vm3334_vm0, %v3333_v0 }
 0x30d   :  { %2901 = vmatprep.subr.mxu0 %v3333_v0 }
 0x30e   :  { %2902 = vmatpush3.msra.mxu0 %v3459_v11 }
 0x30f   :  { %2903 = vmatprep.subr.mxu0 %v3333_v0 }
 0x310   :  { %2904 = vmatpush3.msra.mxu0 %v3468_v12 }
 0x311   :  { %2905 = vmatprep.subr.mxu0 %v3333_v0 }
 0x312   :  { %2906 = vmatpush3.msra.mxu0 %v3476_v13 }
 0x313   :  { %2908 = vmatmul.mubr.msk.f32.vlgmr.msra.gmra.mxu0 %vm274_vm3, %v460_v50  ;;  %881 = vmatprep.subr.mxu0 %v851_v34 }
 0x314   :  { %921 = vmatprep.mubr.f32.mxu0 %v3333_v0  ;;  %882 = vmatpush1.msra.mxu0 %v850_v35 }
 0x3cb   :  { %v529_v59 = vpop.f32.mrf.mxu0 }
 0x3cc   :  { %v530_v60 = vadd.f32 %v529_v59, %v345_v58 }
 0x3cd   :  { %v2898_v61 = vpop.f32.mrf.mxu0 }
 0x3ce   :  { %v2703_v62 = vmul.f32 -1.442695, %v530_v60 }
 0x3d0   :  { %3075 = vpow2.f32 %v2703_v62 }
 0x3d3   :  { %v714_v1 = vpop.f32.mrf.mxu0 }
 0x3d4   :  { %v718_v2 = vadd.f32 %v714_v1, %v231_v63 }
 0x3d5   :  { %v2909_v3 = vpop.f32.mrf.mxu0 }
 0x3d6   :  { %v2707_v4 = vmul.f32 -1.442695, %v718_v2  ;;  %v236_v3 = vadd.f32 %v3493_v18, %v3572_v52 }
 0x3d8   :  { %3077 = vpow2.f32 %v2707_v4 }
 0x3dd   :  { %v3076_v5 = vpop.eup %3075 }
 0x3de   :  { %v536_v6 = vadd.f32 1.0, %v3076_v5 }
 0x3e0   :  { %3079 = vrcp.f32 %v536_v6 }
 0x3e5   :  { %v3078_v7 = vpop.eup %3077 }
 0x3e6   :  { %v722_v8 = vadd.f32 1.0, %v3078_v7 }
 0x3e8   :  { %3081 = vrcp.f32 %v722_v8 }
 0x3ed   :  { %v3080_v9 = vpop.eup %3079 }
 0x3ee   :  { %v539_v14 = vmul.f32 2.0, %v3080_v9 }
 0x3f0   :  { %v2704_v15 = vadd.f32 -1.0, %v539_v14 }
 0x3f2   :  { %547 = vrot.lane.b32.xlu1 %v2704_v15, %s3335_s1 }
 0x3f5   :  { %v3082_v19 = vpop.eup %3081 }
 0x3f6   :  { %542 = vrot.lane.b32.xlu1 %v269_v17, %s3336_s29  ;;  %v725_v16 = vmul.f32 2.0, %v3082_v19  ;;  %v727_v29 = vmul.f32 %v3082_v19, %v3499_v36  ;;  %v562_v36 = vld [vmem:[#allocation8] sm:$0xff] }
 0x3f7   :  { %606 = vmatpush1.msra.mxu1 %v562_v36  ;;  %v845_v36 = vld [vmem:[#allocation8 + $0x48] sm:$0xff] }
 0x3f8   :  { %v2708_v20 = vadd.f32 -1.0, %v725_v16  ;;  %2910 = vmatprep.subr.mxu1 %v3333_v0 }
 0x3fa   :  { %729 = vrot.lane.b32.xlu0 %v2708_v20, %s3335_s1 }
 0x464   :  { %v548_v21 = vpop.permute.xlu1 %547 }
 0x465   :  { %v550_v22 = vmul.f32 %v3080_v9, %v548_v21 }
 0x467   :  { %552 = vrot.lane.b32.xlu0 %v550_v22, %s3336_s29 }
 0x468   :  { %v543_v25 = vpop.permute.xlu1 %542 }
 0x469   :  { %v545_v26 = vmul.f32 %v3080_v9, %v543_v25 }
 0x46c   :  { %v730_v23 = vpop.permute.xlu0 %729 }
 0x46d   :  { %v732_v24 = vmul.f32 %v3082_v19, %v730_v23 }
 0x46f   :  { %734 = vrot.lane.b32.xlu1 %v732_v24, %s3336_s29 }
 0x4d9   :  { %v553_v27 = vpop.permute.xlu0 %552 }
 0x4da   :  { %v3596_v28 = vadd.f32 %v553_v27, %v545_v26 }
 0x4dc   :  { %3083 = vtanh.f32 %v3596_v28 }
 0x4e1   :  { %v735_v30 = vpop.permute.xlu1 %734 }
 0x4e2   :  { %v3600_v31 = vadd.f32 %v735_v30, %v727_v29 }
 0x4e4   :  { %3085 = vtanh.f32 %v3600_v31 }
 0x4e9   :  { %v3084_v38 = vpop.eup %3083 }
 0x4ea   :  { %558 = vrot.lane.b32.xlu0 %v3084_v38, %s3335_s1  ;;  %v849_v38 = vld [vmem:[#allocation8 + $0x68] sm:$0xff] }
 0x4eb   :  { %883 = vmatprep.subr.mxu0 %v849_v38 }
 0x4ec   :  { %884 = vmatpush1.msra.mxu0 %v848_v39 }
 0x4f1   :  { %v3086_v44 = vpop.eup %3085 }
 0x4f2   :  { %740 = vrot.lane.b32.xlu1 %v3086_v44, %s3335_s1 }
 0x55c   :  { %v559_v46 = vpop.permute.xlu0 %558 }
 0x55d   :  { %v561_v47 = vmul.f32 %v3080_v9, %v559_v46 }
 0x55f   :  { %571 = vrot.lane.b32.xlu0 %v561_v47, %s3336_s29 }
 0x564   :  { %v741_v48 = vpop.permute.xlu1 %740 }
 0x565   :  { %v743_v49 = vmul.f32 %v3082_v19, %v741_v48 }
 0x567   :  { %745 = vrot.lane.b32.xlu1 %v743_v49, %s3336_s29 }
 0x5d1   :  { %v572_v50 = vpop.permute.xlu0 %571 }
 0x5d2   :  { %2705 = vmatmul.mubr.msk.f32.vlgmr.msra.gmra.mxu1 %vm274_vm3, %v572_v50 }
 0x5d3   :  { %2911 = vmatpush3.msra.mxu1 %v3505_v37  ;;  %2918 = vmatprep.mubr.msk.f32.mxu1 %vm3334_vm0, %v3333_v0 }
 0x5d4   :  { %2912 = vmatprep.subr.mxu1 %v3333_v0 }
 0x5d5   :  { %2913 = vmatpush3.msra.mxu1 %v3518_v40 }
 0x5d6   :  { %2914 = vmatprep.subr.mxu1 %v3333_v0 }
 0x5d7   :  { %2915 = vmatpush3.msra.mxu1 %v3528_v42 }
 0x5d8   :  { %2916 = vmatprep.subr.mxu1 %v3333_v0 }
 0x5d9   :  { %v746_v58 = vpop.permute.xlu1 %745  ;;  %2917 = vmatpush3.msra.mxu1 %v3542_v45 }
 0x5da   :  { %2919 = vmatmul.mubr.msk.f32.vlgmr.msra.gmra.mxu1 %vm274_vm3, %v746_v58  ;;  %2921 = vmatprep.subr.mxu1 %v3333_v0 }
 0x5db   :  { %2922 = vmatpush3.msra.mxu1 %v3451_v10  ;;  %2929 = vmatprep.mubr.msk.f32.mxu1 %vm3334_vm0, %v3333_v0 }
 0x5dc   :  { %2923 = vmatprep.subr.mxu1 %v3333_v0 }
 0x5dd   :  { %2924 = vmatpush3.msra.mxu1 %v3459_v11 }
 0x5de   :  { %2925 = vmatprep.subr.mxu1 %v3333_v0 }
 0x5df   :  { %2926 = vmatpush3.msra.mxu1 %v3468_v12 }
 0x5e0   :  { %2927 = vmatprep.subr.mxu1 %v3333_v0 }
 0x5e1   :  { %2928 = vmatpush3.msra.mxu1 %v3476_v13 }
 0x5e2   :  { %2930 = vmatmul.mubr.msk.f32.vlgmr.msra.gmra.mxu1 %vm274_vm3, %v746_v58 }
 0x5e3   :  { %1203 = vmatprep.mubr.f32.mxu1 %v3333_v0 }
 0x692   :  { %v641_v59 = vpop.f32.mrf.mxu1 }
 0x693   :  { %v646_v61 = vadd.f32 %v3583_v56, %v641_v59  ;;  %v2698_v59 = vld [vmem:[%s3988_s10] ss:$0 sm:$0xff] }
 0x694   :  { %v3631_v60 = vpop.f32.mrf.mxu1 }
 0x69a   :  { %v815_v62 = vpop.f32.mrf.mxu1 }
 0x69b   :  { %v816_v63 = vadd.f32 %v815_v62, %v646_v61  ;;  %v647_v62 = vadd.f32 %v2698_v59, %v3631_v60 }
 0x69c   :  { %v2920_v1 = vpop.f32.mrf.mxu1 }
 0x69d   :  { %v2710_v2 = vmul.f32 -1.442695, %v816_v63 }
 0x69f   :  { %3087 = vpow2.f32 %v2710_v2 }
 0x6a2   :  { %v996_v4 = vpop.f32.mrf.mxu1 }
 0x6a3   :  { %v1000_v5 = vadd.f32 %v996_v4, %v236_v3 }
 0x6a4   :  { %v2931_v6 = vpop.f32.mrf.mxu1 }
 0x6a5   :  { %v2714_v7 = vmul.f32 -1.442695, %v1000_v5 }
 0x6a7   :  { %3089 = vpow2.f32 %v2714_v7  ;;  %v241_v7 = vadd.f32 %v3570_v51, %v3493_v18 }
 0x6ac   :  { %v3088_v8 = vpop.eup %3087 }
 0x6ad   :  { %v822_v9 = vadd.f32 1.0, %v3088_v8 }
 0x6af   :  { %3091 = vrcp.f32 %v822_v9 }
 0x6b4   :  { %v3090_v14 = vpop.eup %3089 }
 0x6b5   :  { %v1004_v15 = vadd.f32 1.0, %v3090_v14 }
 0x6b7   :  { %3093 = vrcp.f32 %v1004_v15 }
 0x6bc   :  { %v3092_v17 = vpop.eup %3091 }
 0x6bd   :  { %v825_v19 = vmul.f32 2.0, %v3092_v17  ;;  %v827_v26 = vmul.f32 %v3092_v17, %v3596_v28  ;;  %v847_v28 = vld [vmem:[#allocation8 + $0x58] sm:$0xff] }
 0x6be   :  { %885 = vmatprep.subr.mxu0 %v847_v28  ;;  %v1132_v28 = vld [vmem:[#allocation8 + $0xb0] sm:$0xff] }
 0x6bf   :  { %v2711_v16 = vadd.f32 -1.0, %v825_v19  ;;  %886 = vmatpush1.msra.mxu0 %v846_v43  ;;  %v1131_v43 = vld [vmem:[#allocation8 + $0xa8] sm:$0xff] }
 0x6c0   :  { %887 = vmatprep.subr.mxu0 %v845_v36  ;;  %v1130_v36 = vld [vmem:[#allocation8 + $0xa0] sm:$0xff] }
 0x6c1   :  { %829 = vrot.lane.b32.xlu0 %v2711_v16, %s3335_s1 }
 0x6c4   :  { %v3094_v20 = vpop.eup %3093 }
 0x6c5   :  { %v1007_v21 = vmul.f32 2.0, %v3094_v20  ;;  %v1009_v30 = vmul.f32 %v3094_v20, %v3600_v31  ;;  %v844_v31 = vld [vmem:[#allocation8 + $0x40] sm:$0xff] }
 0x6c6   :  { %888 = vmatpush1.msra.mxu0 %v844_v31 }
 0x6c7   :  { %v2715_v22 = vadd.f32 -1.0, %v1007_v21  ;;  %2932 = vmatprep.subr.mxu0 %v3333_v0 }
 0x6c9   :  { %1011 = vrot.lane.b32.xlu1 %v2715_v22, %s3335_s1 }
 0x733   :  { %v830_v52 = vpop.permute.xlu0 %829 }
 0x734   :  { %v832_v23 = vmul.f32 %v3092_v17, %v830_v52 }
 0x736   :  { %834 = vrot.lane.b32.xlu0 %v832_v23, %s3336_s29 }
 0x73b   :  { %v1012_v24 = vpop.permute.xlu1 %1011 }
 0x73c   :  { %v1014_v25 = vmul.f32 %v3094_v20, %v1012_v24 }
 0x73e   :  { %1016 = vrot.lane.b32.xlu1 %v1014_v25, %s3336_s29 }
 0x7a8   :  { %v835_v27 = vpop.permute.xlu0 %834 }
 0x7a9   :  { %v3641_v29 = vadd.f32 %v835_v27, %v827_v26 }
 0x7ab   :  { %3095 = vtanh.f32 %v3641_v29 }
 0x7b0   :  { %v1017_v32 = vpop.permute.xlu1 %1016 }
 0x7b1   :  { %v3645_v33 = vadd.f32 %v1017_v32, %v1009_v30 }
 0x7b3   :  { %3097 = vtanh.f32 %v3645_v33 }
 0x7b8   :  { %v3096_v41 = vpop.eup %3095 }
 0x7b9   :  { %840 = vrot.lane.b32.xlu0 %v3096_v41, %s3335_s1  ;;  %v1133_v41 = vld [vmem:[#allocation8 + $0xb8] sm:$0xff] }
 0x7ba   :  { %1163 = vmatprep.subr.mxu1 %v1133_v41 }
 0x7bb   :  { %1164 = vmatpush1.msra.mxu1 %v1132_v28  ;;  %v1415_v28 = vld [vmem:[#allocation8 + $0xf8] sm:$0xff] }
 0x7bc   :  { %1165 = vmatprep.subr.mxu1 %v1131_v43  ;;  %v1414_v43 = vld [vmem:[#allocation8 + $0xf0] sm:$0xff] }
 0x7bd   :  { %1166 = vmatpush1.msra.mxu1 %v1130_v36  ;;  %v1413_v36 = vld [vmem:[#allocation8 + $0xe8] sm:$0xff] }
 0x7c0   :  { %v3098_v44 = vpop.eup %3097 }
 0x7c1   :  { %1022 = vrot.lane.b32.xlu1 %v3098_v44, %s3335_s1  ;;  %v1128_v44 = vld [vmem:[#allocation8 + $0x90] sm:$0xff] }
 0x82b   :  { %v841_v46 = vpop.permute.xlu0 %840 }
 0x82c   :  { %v843_v47 = vmul.f32 %v3092_v17, %v841_v46  ;;  %v1127_v46 = vld [vmem:[#allocation8 + $0x88] sm:$0xff] }
 0x82e   :  { %853 = vrot.lane.b32.xlu0 %v843_v47, %s3336_s29 }
 0x833   :  { %v1023_v48 = vpop.permute.xlu1 %1022 }
 0x834   :  { %v1025_v49 = vmul.f32 %v3094_v20, %v1023_v48 }
 0x836   :  { %1027 = vrot.lane.b32.xlu1 %v1025_v49, %s3336_s29 }
 0x8a0   :  { %v854_v50 = vpop.permute.xlu0 %853 }
 0x8a1   :  { %2712 = vmatmul.mubr.msk.f32.vlgmr.msra.gmra.mxu0 %vm274_vm3, %v854_v50 }
 0x8a2   :  { %2933 = vmatpush3.msra.mxu0 %v3505_v37  ;;  %2940 = vmatprep.mubr.msk.f32.mxu0 %vm3334_vm0, %v3333_v0 }
 0x8a3   :  { %2934 = vmatprep.subr.mxu0 %v3333_v0 }
 0x8a4   :  { %2935 = vmatpush3.msra.mxu0 %v3518_v40 }
 0x8a5   :  { %2936 = vmatprep.subr.mxu0 %v3333_v0 }
 0x8a6   :  { %2937 = vmatpush3.msra.mxu0 %v3528_v42 }
 0x8a7   :  { %2938 = vmatprep.subr.mxu0 %v3333_v0 }
 0x8a8   :  { %2939 = vmatpush3.msra.mxu0 %v3542_v45  ;;  %v1028_v58 = vpop.permute.xlu1 %1027 }
 0x8a9   :  { %2943 = vmatprep.subr.mxu0 %v3333_v0  ;;  %2941 = vmatmul.mubr.msk.f32.vlgmr.msra.gmra.mxu0 %vm274_vm3, %v1028_v58 }
 0x8aa   :  { %2944 = vmatpush3.msra.mxu0 %v3451_v10  ;;  %2951 = vmatprep.mubr.msk.f32.mxu0 %vm3334_vm0, %v3333_v0 }
 0x8ab   :  { %2945 = vmatprep.subr.mxu0 %v3333_v0 }
 0x8ac   :  { %2946 = vmatpush3.msra.mxu0 %v3459_v11 }
 0x8ad   :  { %2947 = vmatprep.subr.mxu0 %v3333_v0 }
 0x8ae   :  { %2948 = vmatpush3.msra.mxu0 %v3468_v12 }
 0x8af   :  { %2949 = vmatprep.subr.mxu0 %v3333_v0 }
 0x8b0   :  { %2950 = vmatpush3.msra.mxu0 %v3476_v13 }
 0x8b1   :  { %2952 = vmatmul.mubr.msk.f32.vlgmr.msra.gmra.mxu0 %vm274_vm3, %v1028_v58  ;;  %1445 = vmatprep.subr.mxu0 %v1415_v28  ;;  %v1692_v28 = vld [vmem:[#allocation8 + $0x110] sm:$0xff] }
 0x8b2   :  { %1485 = vmatprep.mubr.f32.mxu0 %v3333_v0  ;;  %1446 = vmatpush1.msra.mxu0 %v1414_v43  ;;  %v1691_v43 = vld [vmem:[#allocation8 + $0x108] sm:$0xff] }
 0x8b3   :  { %1447 = vmatprep.subr.mxu0 %v1413_v36 }
 0x961   :  { %v923_v61 = vpop.f32.mrf.mxu0 }
 0x962   :  { %v928_v2 = vadd.f32 %v3583_v56, %v923_v61 }
 0x963   :  { %v925_v63 = vpop.f32.mrf.mxu0 }
 0x964   :  { %v3680_v1 = vadd.f32 %v925_v63, %v647_v62 }
 0x969   :  { %v1097_v3 = vpop.f32.mrf.mxu0 }
 0x96a   :  { %v1098_v4 = vadd.f32 %v1097_v3, %v928_v2 }
 0x96b   :  { %v2942_v5 = vpop.f32.mrf.mxu0 }
 0x96c   :  { %v2717_v6 = vmul.f32 -1.442695, %v1098_v4 }
 0x96e   :  { %3099 = vpow2.f32 %v2717_v6 }
 0x971   :  { %v1278_v8 = vpop.f32.mrf.mxu0 }
 0x972   :  { %v1282_v9 = vadd.f32 %v1278_v8, %v241_v7  ;;  %v246_v8 = vadd.f32 %v3493_v18, %v3576_v54 }
 0x973   :  { %v2953_v14 = vpop.f32.mrf.mxu0 }
 0x974   :  { %v2721_v15 = vmul.f32 -1.442695, %v1282_v9 }
 0x976   :  { %3101 = vpow2.f32 %v2721_v15 }
 0x97b   :  { %v3100_v17 = vpop.eup %3099 }
 0x97c   :  { %v1104_v60 = vadd.f32 1.0, %v3100_v17 }
 0x97e   :  { %3103 = vrcp.f32 %v1104_v60 }
 0x983   :  { %v3102_v19 = vpop.eup %3101 }
 0x984   :  { %v1286_v16 = vadd.f32 1.0, %v3102_v19 }
 0x986   :  { %3105 = vrcp.f32 %v1286_v16 }
 0x98b   :  { %v3104_v20 = vpop.eup %3103 }
 0x98c   :  { %v1107_v21 = vmul.f32 2.0, %v3104_v20  ;;  %v1109_v30 = vmul.f32 %v3104_v20, %v3641_v29  ;;  %v1129_v29 = vld [vmem:[#allocation8 + $0x98] sm:$0xff] }
 0x98d   :  { %1167 = vmatprep.subr.mxu1 %v1129_v29 }
 0x98e   :  { %v2718_v22 = vadd.f32 -1.0, %v1107_v21  ;;  %1168 = vmatpush1.msra.mxu1 %v1128_v44  ;;  %v1410_v44 = vld [vmem:[#allocation8 + $0xd0] sm:$0xff] }
 0x98f   :  { %1169 = vmatprep.subr.mxu1 %v1127_v46  ;;  %v1409_v46 = vld [vmem:[#allocation8 + $0xc8] sm:$0xff] }
 0x990   :  { %1111 = vrot.lane.b32.xlu0 %v2718_v22, %s3335_s1 }
 0x993   :  { %v3106_v52 = vpop.eup %3105 }
 0x994   :  { %v1289_v23 = vmul.f32 2.0, %v3106_v52  ;;  %v1291_v35 = vmul.f32 %v3106_v52, %v3645_v33  ;;  %v1126_v33 = vld [vmem:[#allocation8 + $0x80] sm:$0xff] }
 0x995   :  { %1170 = vmatpush1.msra.mxu1 %v1126_v33 }
 0x996   :  { %v2722_v24 = vadd.f32 -1.0, %v1289_v23  ;;  %2954 = vmatprep.subr.mxu1 %v3333_v0 }
 0x998   :  { %1293 = vrot.lane.b32.xlu1 %v2722_v24, %s3335_s1 }
 0xa02   :  { %v1112_v51 = vpop.permute.xlu0 %1111 }
 0xa03   :  { %v1114_v25 = vmul.f32 %v3104_v20, %v1112_v51 }
 0xa05   :  { %1116 = vrot.lane.b32.xlu0 %v1114_v25, %s3336_s29 }
 0xa0a   :  { %v1294_v26 = vpop.permute.xlu1 %1293 }
 0xa0b   :  { %v1296_v27 = vmul.f32 %v3106_v52, %v1294_v26 }
 0xa0d   :  { %1298 = vrot.lane.b32.xlu1 %v1296_v27, %s3336_s29 }
 0xa77   :  { %v1117_v32 = vpop.permute.xlu0 %1116 }
 0xa78   :  { %v3690_v34 = vadd.f32 %v1117_v32, %v1109_v30 }
 0xa7a   :  { %3107 = vtanh.f32 %v3690_v34 }
 0xa7f   :  { %v1299_v38 = vpop.permute.xlu1 %1298 }
 0xa80   :  { %v3694_v39 = vadd.f32 %v1299_v38, %v1291_v35 }
 0xa82   :  { %3109 = vtanh.f32 %v3694_v39 }
 0xa87   :  { %v3108_v31 = vpop.eup %3107 }
 0xa88   :  { %1122 = vrot.lane.b32.xlu0 %v3108_v31, %s3335_s1  ;;  %v1412_v31 = vld [vmem:[#allocation8 + $0xe0] sm:$0xff] }
 0xa89   :  { %1448 = vmatpush1.msra.mxu0 %v1412_v31 }
 0xa8f   :  { %v3110_v47 = vpop.eup %3109 }
 0xa90   :  { %1304 = vrot.lane.b32.xlu1 %v3110_v47, %s3335_s1 }
 0xafa   :  { %v1123_v48 = vpop.permute.xlu0 %1122 }
 0xafb   :  { %v1125_v49 = vmul.f32 %v3104_v20, %v1123_v48 }
 0xafd   :  { %1135 = vrot.lane.b32.xlu0 %v1125_v49, %s3336_s29 }
 0xb02   :  { %v1305_v50 = vpop.permute.xlu1 %1304 }
 0xb03   :  { %v1307_v58 = vmul.f32 %v3106_v52, %v1305_v50 }
 0xb05   :  { %1309 = vrot.lane.b32.xlu1 %v1307_v58, %s3336_s29 }
 0xb6f   :  { %v1136_v59 = vpop.permute.xlu0 %1135 }
 0xb70   :  { %2719 = vmatmul.mubr.msk.f32.vlgmr.msra.gmra.mxu1 %vm274_vm3, %v1136_v59 }
 0xb71   :  { %2955 = vmatpush3.msra.mxu1 %v3505_v37  ;;  %2962 = vmatprep.mubr.msk.f32.mxu1 %vm3334_vm0, %v3333_v0 }
 0xb72   :  { %2956 = vmatprep.subr.mxu1 %v3333_v0 }
 0xb73   :  { %2957 = vmatpush3.msra.mxu1 %v3518_v40 }
 0xb74   :  { %2958 = vmatprep.subr.mxu1 %v3333_v0 }
 0xb75   :  { %2959 = vmatpush3.msra.mxu1 %v3528_v42 }
 0xb76   :  { %2960 = vmatprep.subr.mxu1 %v3333_v0 }
 0xb77   :  { %2961 = vmatpush3.msra.mxu1 %v3542_v45  ;;  %v1310_v61 = vpop.permute.xlu1 %1309 }
 0xb78   :  { %2963 = vmatmul.mubr.msk.f32.vlgmr.msra.gmra.mxu1 %vm274_vm3, %v1310_v61  ;;  %2965 = vmatprep.subr.mxu1 %v3333_v0 }
 0xb79   :  { %2966 = vmatpush3.msra.mxu1 %v3451_v10  ;;  %2973 = vmatprep.mubr.msk.f32.mxu1 %vm3334_vm0, %v3333_v0 }
 0xb7a   :  { %2967 = vmatprep.subr.mxu1 %v3333_v0 }
 0xb7b   :  { %2968 = vmatpush3.msra.mxu1 %v3459_v11 }
 0xb7c   :  { %2969 = vmatprep.subr.mxu1 %v3333_v0 }
 0xb7d   :  { %2970 = vmatpush3.msra.mxu1 %v3468_v12 }
 0xb7e   :  { %2971 = vmatprep.subr.mxu1 %v3333_v0 }
 0xb7f   :  { %2972 = vmatpush3.msra.mxu1 %v3476_v13 }
 0xb80   :  { %2974 = vmatmul.mubr.msk.f32.vlgmr.msra.gmra.mxu1 %vm274_vm3, %v1310_v61 }
 0xb81   :  { %1767 = vmatprep.mubr.f32.mxu1 %v3333_v0 }
 0xc30   :  { %v1205_v62 = vpop.f32.mrf.mxu1 }
 0xc31   :  { %v1210_v3 = vadd.f32 %v3583_v56, %v1205_v62 }
 0xc32   :  { %v1207_v63 = vpop.f32.mrf.mxu1 }
 0xc33   :  { %v3726_v2 = vadd.f32 %v1207_v63, %v3680_v1 }
 0xc38   :  { %v1379_v4 = vpop.f32.mrf.mxu1 }
 0xc39   :  { %v1380_v5 = vadd.f32 %v1379_v4, %v1210_v3 }
 0xc3a   :  { %v2964_v6 = vpop.f32.mrf.mxu1 }
 0xc3b   :  { %v2724_v7 = vmul.f32 -1.442695, %v1380_v5 }
 0xc3d   :  { %3111 = vpow2.f32 %v2724_v7 }
 0xc40   :  { %v1560_v9 = vpop.f32.mrf.mxu1 }
 0xc41   :  { %v1564_v14 = vadd.f32 %v1560_v9, %v246_v8 }
 0xc42   :  { %v2975_v15 = vpop.f32.mrf.mxu1 }
 0xc43   :  { %v2728_v17 = vmul.f32 -1.442695, %v1564_v14 }
 0xc45   :  { %3113 = vpow2.f32 %v2728_v17 }
 0xc4a   :  { %v3112_v60 = vpop.eup %3111 }
 0xc4b   :  { %v1386_v19 = vadd.f32 1.0, %v3112_v60 }
 0xc4d   :  { %3115 = vrcp.f32 %v1386_v19 }
 0xc52   :  { %v3114_v1 = vpop.eup %3113 }
 0xc53   :  { %v1568_v16 = vadd.f32 1.0, %v3114_v1 }
 0xc55   :  { %3117 = vrcp.f32 %v1568_v16 }
 0xc5a   :  { %v3116_v20 = vpop.eup %3115 }
 0xc5b   :  { %v1389_v21 = vmul.f32 2.0, %v3116_v20  ;;  %v1391_v27 = vmul.f32 %v3116_v20, %v3690_v34  ;;  %v1411_v34 = vld [vmem:[#allocation8 + $0xd8] sm:$0xff] }
 0xc5c   :  { %1449 = vmatprep.subr.mxu0 %v1411_v34 }
 0xc5d   :  { %v2725_v22 = vadd.f32 -1.0, %v1389_v21  ;;  %1450 = vmatpush1.msra.mxu0 %v1410_v44 }
 0xc5e   :  { %1451 = vmatprep.subr.mxu0 %v1409_v46 }
 0xc5f   :  { %1393 = vrot.lane.b32.xlu0 %v2725_v22, %s3335_s1 }
 0xc62   :  { %v3118_v52 = vpop.eup %3117 }
 0xc63   :  { %v1571_v23 = vmul.f32 2.0, %v3118_v52  ;;  %v1573_v35 = vmul.f32 %v3118_v52, %v3694_v39  ;;  %v1408_v39 = vld [vmem:[#allocation8 + $0xc0] sm:$0xff] }
 0xc64   :  { %1452 = vmatpush1.msra.mxu0 %v1408_v39 }
 0xc65   :  { %v2729_v24 = vadd.f32 -1.0, %v1571_v23  ;;  %2976 = vmatprep.subr.mxu0 %v3333_v0 }
 0xc67   :  { %1575 = vrot.lane.b32.xlu1 %v2729_v24, %s3335_s1 }
 0xcd1   :  { %v1394_v54 = vpop.permute.xlu0 %1393 }
 0xcd2   :  { %v1396_v51 = vmul.f32 %v3116_v20, %v1394_v54 }
 0xcd4   :  { %1398 = vrot.lane.b32.xlu0 %v1396_v51, %s3336_s29 }
 0xcd9   :  { %v1576_v25 = vpop.permute.xlu1 %1575 }
 0xcda   :  { %v1578_v26 = vmul.f32 %v3118_v52, %v1576_v25 }
 0xcdc   :  { %1580 = vrot.lane.b32.xlu1 %v1578_v26, %s3336_s29  ;;  %v1697_v26 = vld [vmem:[#allocation8 + $0x138] sm:$0xff] }
 0xcdd   :  { %1727 = vmatprep.subr.mxu1 %v1697_v26  ;;  %v1973_v26 = vld [vmem:[#allocation8 + $0x148] sm:$0xff] }
 0xd46   :  { %v1399_v30 = vpop.permute.xlu0 %1398 }
 0xd47   :  { %v3736_v32 = vadd.f32 %v1399_v30, %v1391_v27  ;;  %v1696_v27 = vld [vmem:[#allocation8 + $0x130] sm:$0xff]  ;;  %v1695_v30 = vld [vmem:[#allocation8 + $0x128] sm:$0xff] }
 0xd48   :  { %1728 = vmatpush1.msra.mxu1 %v1696_v27 }
 0xd49   :  { %3119 = vtanh.f32 %v3736_v32  ;;  %1729 = vmatprep.subr.mxu1 %v1695_v30 }
 0xd4e   :  { %v1581_v38 = vpop.permute.xlu1 %1580 }
 0xd4f   :  { %v3740_v41 = vadd.f32 %v1581_v38, %v1573_v35  ;;  %v1694_v35 = vld [vmem:[#allocation8 + $0x120] sm:$0xff] }
 0xd50   :  { %1730 = vmatpush1.msra.mxu1 %v1694_v35 }
 0xd51   :  { %3121 = vtanh.f32 %v3740_v41 }
 0xd56   :  { %v3120_v29 = vpop.eup %3119 }
 0xd57   :  { %1404 = vrot.lane.b32.xlu0 %v3120_v29, %s3335_s1 }
 0xd5e   :  { %v3122_v33 = vpop.eup %3121 }
 0xd5f   :  { %1586 = vrot.lane.b32.xlu1 %v3122_v33, %s3335_s1 }
 0xdc9   :  { %v1405_v47 = vpop.permute.xlu0 %1404 }
 0xdca   :  { %v1407_v48 = vmul.f32 %v3116_v20, %v1405_v47 }
 0xdcc   :  { %1417 = vrot.lane.b32.xlu0 %v1407_v48, %s3336_s29 }
 0xdd1   :  { %v1587_v49 = vpop.permute.xlu1 %1586 }
 0xdd2   :  { %v1589_v50 = vmul.f32 %v3118_v52, %v1587_v49 }
 0xdd4   :  { %1591 = vrot.lane.b32.xlu1 %v1589_v50, %s3336_s29 }
 0xe3e   :  { %v1418_v58 = vpop.permute.xlu0 %1417 }
 0xe3f   :  { %2726 = vmatmul.mubr.msk.f32.vlgmr.msra.gmra.mxu0 %vm274_vm3, %v1418_v58 }
 0xe40   :  { %2977 = vmatpush3.msra.mxu0 %v3505_v37  ;;  %2984 = vmatprep.mubr.msk.f32.mxu0 %vm3334_vm0, %v3333_v0 }
 0xe41   :  { %2978 = vmatprep.subr.mxu0 %v3333_v0 }
 0xe42   :  { %2979 = vmatpush3.msra.mxu0 %v3518_v40 }
 0xe43   :  { %2980 = vmatprep.subr.mxu0 %v3333_v0 }
 0xe44   :  { %2981 = vmatpush3.msra.mxu0 %v3528_v42 }
 0xe45   :  { %2982 = vmatprep.subr.mxu0 %v3333_v0 }
 0xe46   :  { %2983 = vmatpush3.msra.mxu0 %v3542_v45  ;;  %v1592_v59 = vpop.permute.xlu1 %1591 }
 0xe47   :  { %2987 = vmatprep.subr.mxu0 %v3333_v0  ;;  %2985 = vmatmul.mubr.msk.f32.vlgmr.msra.gmra.mxu0 %vm274_vm3, %v1592_v59 }
 0xe48   :  { %2988 = vmatpush3.msra.mxu0 %v3451_v10  ;;  %2995 = vmatprep.mubr.msk.f32.mxu0 %vm3334_vm0, %v3333_v0 }
 0xe49   :  { %2989 = vmatprep.subr.mxu0 %v3333_v0 }
 0xe4a   :  { %2990 = vmatpush3.msra.mxu0 %v3459_v11 }
 0xe4b   :  { %2991 = vmatprep.subr.mxu0 %v3333_v0 }
 0xe4c   :  { %2992 = vmatpush3.msra.mxu0 %v3468_v12  ;;  %v251_v12 = vadd.f32 %v3574_v53, %v3493_v18 }
 0xe4d   :  { %2993 = vmatprep.subr.mxu0 %v3333_v0 }
 0xe4e   :  { %2994 = vmatpush3.msra.mxu0 %v3476_v13 }
 0xe4f   :  { %2996 = vmatmul.mubr.msk.f32.vlgmr.msra.gmra.mxu0 %vm274_vm3, %v1592_v59 }
 0xe50   :  { %2049 = vmatprep.mubr.f32.mxu0 %v3333_v0 }
 0xeff   :  { %v1487_v10 = vpop.f32.mrf.mxu0 }
 0xf00   :  { %v1492_v63 = vadd.f32 %v3583_v56, %v1487_v10 }
 0xf01   :  { %v1489_v61 = vpop.f32.mrf.mxu0 }
 0xf02   :  { %v3772_v62 = vadd.f32 %v1489_v61, %v3726_v2  ;;  %v3844_v61 = vld [vmem:[%s3983_s5] ss:$0 sm:$0xff] }
 0xf07   :  { %v1661_v11 = vpop.f32.mrf.mxu0 }
 0xf08   :  { %v1662_v3 = vadd.f32 %v1661_v11, %v1492_v63  ;;  %v256_v63 = vadd.f32 %v3844_v61, %v3585_v57 }
 0xf09   :  { %v2986_v4 = vpop.f32.mrf.mxu0 }
 0xf0a   :  { %v2731_v5 = vmul.f32 -1.442695, %v1662_v3 }
 0xf0c   :  { %3123 = vpow2.f32 %v2731_v5 }
 0xf0f   :  { %v1842_v13 = vpop.f32.mrf.mxu0 }
 0xf10   :  { %v1846_v6 = vadd.f32 %v1842_v13, %v251_v12 }
 0xf11   :  { %v2997_v7 = vpop.f32.mrf.mxu0 }
 0xf12   :  { %v2735_v8 = vmul.f32 -1.442695, %v1846_v6 }
 0xf14   :  { %3125 = vpow2.f32 %v2735_v8 }
 0xf19   :  { %v3124_v9 = vpop.eup %3123 }
 0xf1a   :  { %v1668_v14 = vadd.f32 1.0, %v3124_v9 }
 0xf1c   :  { %3127 = vrcp.f32 %v1668_v14 }
 0xf21   :  { %v3126_v2 = vpop.eup %3125 }
 0xf22   :  { %v1850_v15 = vadd.f32 1.0, %v3126_v2 }
 0xf24   :  { %3129 = vrcp.f32 %v1850_v15 }
 0xf29   :  { %v3128_v17 = vpop.eup %3127 }
 0xf2a   :  { %v1671_v60 = vmul.f32 2.0, %v3128_v17  ;;  %v1673_v52 = vmul.f32 %v3128_v17, %v3736_v32  ;;  %v1693_v32 = vld [vmem:[#allocation8 + $0x118] sm:$0xff] }
 0xf2b   :  { %1731 = vmatprep.subr.mxu1 %v1693_v32 }
 0xf2c   :  { %v2732_v19 = vadd.f32 -1.0, %v1671_v60  ;;  %1732 = vmatpush1.msra.mxu1 %v1692_v28 }
 0xf2d   :  { %1733 = vmatprep.subr.mxu1 %v1691_v43  ;;  %v3869_v43 = vld [vmem:[%s3984_s6 + $0x18] sm:$0xff] }
 0xf2e   :  { %1675 = vrot.lane.b32.xlu0 %v2732_v19, %s3335_s1 }
 0xf31   :  { %v3130_v1 = vpop.eup %3129 }
 0xf32   :  { %v1853_v16 = vmul.f32 2.0, %v3130_v1  ;;  %v1855_v54 = vmul.f32 %v3130_v1, %v3740_v41  ;;  %v1690_v41 = vld [vmem:[#allocation8 + $0x100] sm:$0xff] }
 0xf33   :  { %1734 = vmatpush1.msra.mxu1 %v1690_v41  ;;  %v3878_v41 = vld [vmem:[%s3984_s6 + $0x10] sm:$0xff] }
 0xf34   :  { %v2736_v20 = vadd.f32 -1.0, %v1853_v16  ;;  %2998 = vmatprep.subr.mxu1 %v3333_v0 }
 0xf36   :  { %1857 = vrot.lane.b32.xlu1 %v2736_v20, %s3335_s1 }
 0xfa0   :  { %v1676_v18 = vpop.permute.xlu0 %1675 }
 0xfa1   :  { %v1678_v53 = vmul.f32 %v3128_v17, %v1676_v18 }
 0xfa3   :  { %1680 = vrot.lane.b32.xlu0 %v1678_v53, %s3336_s29 }
 0xfa8   :  { %v1858_v21 = vpop.permute.xlu1 %1857 }
 0xfa9   :  { %v1860_v22 = vmul.f32 %v3130_v1, %v1858_v21  ;;  %v1979_v21 = vld [vmem:[#allocation8 + $0x178] sm:$0xff] }
 0xfaa   :  { %2009 = vmatprep.subr.mxu0 %v1979_v21 }
 0xfab   :  { %1862 = vrot.lane.b32.xlu1 %v1860_v22, %s3336_s29  ;;  %v1978_v22 = vld [vmem:[#allocation8 + $0x170] sm:$0xff] }
 0xfac   :  { %2010 = vmatpush1.msra.mxu0 %v1978_v22 }
0x1015   :  { %v1681_v23 = vpop.permute.xlu0 %1680 }
0x1016   :  { %v3782_v24 = vadd.f32 %v1681_v23, %v1673_v52  ;;  %v1977_v52 = vld [vmem:[#allocation8 + $0x168] sm:$0xff]  ;;  %v1976_v23 = vld [vmem:[#allocation8 + $0x160] sm:$0xff] }
0x1017   :  { %2011 = vmatprep.subr.mxu0 %v1977_v52 }
0x1018   :  { %3131 = vtanh.f32 %v3782_v24  ;;  %2012 = vmatpush1.msra.mxu0 %v1976_v23 }
0x101d   :  { %v1863_v51 = vpop.permute.xlu1 %1862 }
0x101e   :  { %v3786_v25 = vadd.f32 %v1863_v51, %v1855_v54  ;;  %v1974_v51 = vld [vmem:[#allocation8 + $0x150] sm:$0xff] }
0x1020   :  { %3133 = vtanh.f32 %v3786_v25 }
0x1025   :  { %v3132_v38 = vpop.eup %3131 }
0x1026   :  { %1686 = vrot.lane.b32.xlu0 %v3132_v38, %s3335_s1 }
0x102d   :  { %v3134_v36 = vpop.eup %3133 }
0x102e   :  { %1868 = vrot.lane.b32.xlu1 %v3134_v36, %s3335_s1  ;;  %v3885_v36 = vld [vmem:[%s3984_s6 + $0x8] sm:$0xff] }
0x1098   :  { %v1687_v31 = vpop.permute.xlu0 %1686 }
0x1099   :  { %v1689_v29 = vmul.f32 %v3128_v17, %v1687_v31  ;;  %v3892_v31 = vld [vmem:[%s3984_s6] sm:$0xff] }
0x109b   :  { %1699 = vrot.lane.b32.xlu0 %v1689_v29, %s3336_s29 }
0x10a0   :  { %v1869_v34 = vpop.permute.xlu1 %1868 }
0x10a1   :  { %v1871_v44 = vmul.f32 %v3130_v1, %v1869_v34 }
0x10a3   :  { %1873 = vrot.lane.b32.xlu1 %v1871_v44, %s3336_s29 }
0x110d   :  { %v1700_v46 = vpop.permute.xlu0 %1699 }
0x110e   :  { %2733 = vmatmul.mubr.msk.f32.vlgmr.msra.gmra.mxu1 %vm274_vm3, %v1700_v46 }
0x110f   :  { %2999 = vmatpush3.msra.mxu1 %v3505_v37  ;;  %3006 = vmatprep.mubr.msk.f32.mxu1 %vm3334_vm0, %v3333_v0  ;;  %v3809_v37 = vld [vmem:[%s3982_s4 + $0x18] sm:$0xff] }
0x1110   :  { %3000 = vmatprep.subr.mxu1 %v3333_v0 }
0x1111   :  { %3001 = vmatpush3.msra.mxu1 %v3518_v40  ;;  %v3818_v40 = vld [vmem:[%s3982_s4 + $0x10] sm:$0xff] }
0x1112   :  { %3002 = vmatprep.subr.mxu1 %v3333_v0 }
0x1113   :  { %3003 = vmatpush3.msra.mxu1 %v3528_v42  ;;  %v3825_v42 = vld [vmem:[%s3982_s4 + $0x8] sm:$0xff] }
0x1114   :  { %3004 = vmatprep.subr.mxu1 %v3333_v0 }
0x1115   :  { %3005 = vmatpush3.msra.mxu1 %v3542_v45  ;;  %v1874_v39 = vpop.permute.xlu1 %1873  ;;  %v3832_v45 = vld [vmem:[%s3982_s4] sm:$0xff] }
0x1116   :  { %3007 = vmatmul.mubr.msk.f32.vlgmr.msra.gmra.mxu1 %vm274_vm3, %v1874_v39  ;;  %3009 = vmatprep.subr.mxu1 %v3333_v0 }
0x1117   :  { %3010 = vmatpush3.msra.mxu1 %v3809_v37  ;;  %3017 = vmatprep.mubr.msk.f32.mxu1 %vm3334_vm0, %v3333_v0 }
0x1118   :  { %3011 = vmatprep.subr.mxu1 %v3333_v0 }
0x1119   :  { %3012 = vmatpush3.msra.mxu1 %v3818_v40 }
0x111a   :  { %3013 = vmatprep.subr.mxu1 %v3333_v0 }
0x111b   :  { %3014 = vmatpush3.msra.mxu1 %v3825_v42 }
0x111c   :  { %3015 = vmatprep.subr.mxu1 %v3333_v0 }
0x111d   :  { %3016 = vmatpush3.msra.mxu1 %v3832_v45 }
0x111e   :  { %3018 = vmatmul.mubr.msk.f32.vlgmr.msra.gmra.mxu1 %vm274_vm3, %v1874_v39  ;;  %v3914_v39 = vld [vmem:[%s3986_s8] ss:$0 sm:$0xff]  ;;  %s3337_s8 = smov 96  }
0x111f   :  { %2331 = vmatprep.mubr.f32.mxu1 %v3333_v0 }
0x11ce   :  { %v1769_v33 = vpop.f32.mrf.mxu1 }
0x11cf   :  { %v1774_v49 = vadd.f32 %v3583_v56, %v1769_v33 }
0x11d0   :  { %v1771_v47 = vpop.f32.mrf.mxu1 }
0x11d1   :  { %v3838_v48 = vadd.f32 %v1771_v47, %v3772_v62  ;;  %v261_v47 = vadd.f32 %v3844_v61, %v3578_v55 }
0x11d6   :  { %v1943_v50 = vpop.f32.mrf.mxu1 }
0x11d7   :  { %v1944_v58 = vadd.f32 %v1943_v50, %v1774_v49 }
0x11d8   :  { %v3008_v59 = vpop.f32.mrf.mxu1 }
0x11d9   :  { %v2738_v10 = vmul.f32 -1.442695, %v1944_v58 }
0x11db   :  { %3135 = vpow2.f32 %v2738_v10 }
0x11de   :  { %v2124_v11 = vpop.f32.mrf.mxu1 }
0x11df   :  { %v2128_v3 = vadd.f32 %v2124_v11, %v256_v63 }
0x11e0   :  { %v3019_v4 = vpop.f32.mrf.mxu1 }
0x11e1   :  { %v2742_v62 = vmul.f32 -1.442695, %v2128_v3 }
0x11e3   :  { %3137 = vpow2.f32 %v2742_v62 }
0x11e8   :  { %v3136_v5 = vpop.eup %3135 }
0x11e9   :  { %v1950_v56 = vadd.f32 1.0, %v3136_v5 }
0x11eb   :  { %3139 = vrcp.f32 %v1950_v56 }
0x11f0   :  { %v3138_v12 = vpop.eup %3137 }
0x11f1   :  { %v2132_v13 = vadd.f32 1.0, %v3138_v12 }
0x11f3   :  { %3141 = vrcp.f32 %v2132_v13 }
0x11f8   :  { %v3140_v6 = vpop.eup %3139 }
0x11f9   :  { %v1953_v7 = vmul.f32 2.0, %v3140_v6  ;;  %v1955_v19 = vmul.f32 %v3140_v6, %v3782_v24  ;;  %v1975_v24 = vld [vmem:[#allocation8 + $0x158] sm:$0xff] }
0x11fa   :  { %2013 = vmatprep.subr.mxu0 %v1975_v24 }
0x11fb   :  { %v2739_v8 = vadd.f32 -1.0, %v1953_v7  ;;  %2014 = vmatpush1.msra.mxu0 %v1974_v51 }
0x11fc   :  { %2015 = vmatprep.subr.mxu0 %v1973_v26 }
0x11fd   :  { %1957 = vrot.lane.b32.xlu0 %v2739_v8, %s3335_s1 }
0x1200   :  { %v3142_v9 = vpop.eup %3141 }
0x1201   :  { %v2135_v14 = vmul.f32 2.0, %v3142_v9  ;;  %v2137_v20 = vmul.f32 %v3142_v9, %v3786_v25  ;;  %v1972_v25 = vld [vmem:[#allocation8 + $0x140] sm:$0xff] }
0x1202   :  { %2016 = vmatpush1.msra.mxu0 %v1972_v25 }
0x1203   :  { %v2743_v2 = vadd.f32 -1.0, %v2135_v14  ;;  %3020 = vmatprep.subr.mxu0 %v3333_v0 }
0x1205   :  { %2139 = vrot.lane.b32.xlu1 %v2743_v2, %s3335_s1 }
0x126f   :  { %v1958_v57 = vpop.permute.xlu0 %1957 }
0x1270   :  { %v1960_v15 = vmul.f32 %v3140_v6, %v1958_v57 }
0x1272   :  { %1962 = vrot.lane.b32.xlu0 %v1960_v15, %s3336_s29  ;;  %v2261_v15 = vld [vmem:[#allocation8 + $0x1b8] sm:$0xff] }
0x1273   :  { %2291 = vmatprep.subr.mxu1 %v2261_v15 }
0x1277   :  { %v2140_v17 = vpop.permute.xlu1 %2139 }
0x1278   :  { %v2142_v60 = vmul.f32 %v3142_v9, %v2140_v17  ;;  %v2260_v17 = vld [vmem:[#allocation8 + $0x1b0] sm:$0xff] }
0x1279   :  { %2292 = vmatpush1.msra.mxu1 %v2260_v17 }
0x127a   :  { %2144 = vrot.lane.b32.xlu1 %v2142_v60, %s3336_s29  ;;  %v2259_v60 = vld [vmem:[#allocation8 + $0x1a8] sm:$0xff] }
0x127b   :  { %2293 = vmatprep.subr.mxu1 %v2259_v60 }
0x12e4   :  { %v1963_v1 = vpop.permute.xlu0 %1962 }
0x12e5   :  { %v3853_v16 = vadd.f32 %v1963_v1, %v1955_v19  ;;  %v2258_v19 = vld [vmem:[#allocation8 + $0x1a0] sm:$0xff] }
0x12e6   :  { %2294 = vmatpush1.msra.mxu1 %v2258_v19 }
0x12e7   :  { %3143 = vtanh.f32 %v3853_v16 }
0x12ec   :  { %v2145_v18 = vpop.permute.xlu1 %2144 }
0x12ed   :  { %v3857_v53 = vadd.f32 %v2145_v18, %v2137_v20  ;;  %v2256_v20 = vld [vmem:[#allocation8 + $0x190] sm:$0xff]  ;;  %v2255_v18 = vld [vmem:[#allocation8 + $0x188] sm:$0xff] }
0x12ef   :  { %3145 = vtanh.f32 %v3857_v53 }
0x12f4   :  { %v3144_v54 = vpop.eup %3143 }
0x12f5   :  { %1968 = vrot.lane.b32.xlu0 %v3144_v54, %s3335_s1 }
0x12fc   :  { %v3146_v27 = vpop.eup %3145 }
0x12fd   :  { %2150 = vrot.lane.b32.xlu1 %v3146_v27, %s3335_s1 }
0x1367   :  { %v1969_v30 = vpop.permute.xlu0 %1968 }
0x1368   :  { %v1971_v35 = vmul.f32 %v3140_v6, %v1969_v30 }
0x136a   :  { %1981 = vrot.lane.b32.xlu0 %v1971_v35, %s3336_s29 }
0x136f   :  { %v2151_v38 = vpop.permute.xlu1 %2150 }
0x1370   :  { %v2153_v32 = vmul.f32 %v3142_v9, %v2151_v38 }
0x1372   :  { %2155 = vrot.lane.b32.xlu1 %v2153_v32, %s3336_s29 }
0x13dc   :  { %v1982_v28 = vpop.permute.xlu0 %1981 }
0x13dd   :  { %2740 = vmatmul.mubr.msk.f32.vlgmr.msra.gmra.mxu0 %vm274_vm3, %v1982_v28 }
0x13de   :  { %3021 = vmatpush3.msra.mxu0 %v3869_v43  ;;  %3028 = vmatprep.mubr.msk.f32.mxu0 %vm3334_vm0, %v3333_v0 }
0x13df   :  { %3022 = vmatprep.subr.mxu0 %v3333_v0 }
0x13e0   :  { %3023 = vmatpush3.msra.mxu0 %v3878_v41 }
0x13e1   :  { %3024 = vmatprep.subr.mxu0 %v3333_v0 }
0x13e2   :  { %3025 = vmatpush3.msra.mxu0 %v3885_v36 }
0x13e3   :  { %3026 = vmatprep.subr.mxu0 %v3333_v0 }
0x13e4   :  { %3027 = vmatpush3.msra.mxu0 %v3892_v31  ;;  %v2156_v29 = vpop.permute.xlu1 %2155 }
0x13e5   :  { %3031 = vmatprep.subr.mxu0 %v3333_v0  ;;  %3029 = vmatmul.mubr.msk.f32.vlgmr.msra.gmra.mxu0 %vm274_vm3, %v2156_v29 }
0x13e6   :  { %3032 = vmatpush3.msra.mxu0 %v3809_v37  ;;  %3039 = vmatprep.mubr.msk.f32.mxu0 %vm3334_vm0, %v3333_v0 }
0x13e7   :  { %3033 = vmatprep.subr.mxu0 %v3333_v0 }
0x13e8   :  { %3034 = vmatpush3.msra.mxu0 %v3818_v40 }
0x13e9   :  { %3035 = vmatprep.subr.mxu0 %v3333_v0 }
0x13ea   :  { %3036 = vmatpush3.msra.mxu0 %v3825_v42 }
0x13eb   :  { %3037 = vmatprep.subr.mxu0 %v3333_v0 }
0x13ec   :  { %3038 = vmatpush3.msra.mxu0 %v3832_v45 }
0x13ed   :  { %3040 = vmatmul.mubr.msk.f32.vlgmr.msra.gmra.mxu0 %vm274_vm3, %v2156_v29 }
0x13ee   :  { %2613 = vmatprep.mubr.f32.mxu0 %v3333_v0 }
0x149d   :  { %v2051_v34 = vpop.f32.mrf.mxu0 }
0x149e   :  { %v2056_v37 = vadd.f32 %v3914_v39, %v2051_v34 }
0x149f   :  { %v2053_v44 = vpop.f32.mrf.mxu0 }
0x14a0   :  { %v3909_v46 = vadd.f32 %v2053_v44, %v3838_v48 }
0x14a5   :  { %v2225_v40 = vpop.f32.mrf.mxu0 }
0x14a6   :  { %v2226_v42 = vadd.f32 %v2225_v40, %v2056_v37  ;;  %v2543_v37 = vld [vmem:[#allocation8 + $0x1f8] sm:$0xff]  ;;  %v2542_v40 = vld [vmem:[#allocation8 + $0x1f0] sm:$0xff] }
0x14a7   :  { %v3030_v33 = vpop.f32.mrf.mxu0  ;;  %2573 = vmatprep.subr.mxu0 %v2543_v37 }
0x14a8   :  { %v2745_v45 = vmul.f32 -1.442695, %v2226_v42  ;;  %v2541_v42 = vld [vmem:[#allocation8 + $0x1e8] sm:$0xff]  ;;  %v2540_v33 = vld [vmem:[#allocation8 + $0x1e0] sm:$0xff]  ;;  %2574 = vmatpush1.msra.mxu0 %v2542_v40 }
0x14a9   :  { %2575 = vmatprep.subr.mxu0 %v2541_v42 }
0x14aa   :  { %3147 = vpow2.f32 %v2745_v45  ;;  %v2539_v45 = vld [vmem:[#allocation8 + $0x1d8] sm:$0xff]  ;;  %2576 = vmatpush1.msra.mxu0 %v2540_v33 }
0x14ab   :  { %2577 = vmatprep.subr.mxu0 %v2539_v45 }
0x14ad   :  { %v2406_v49 = vpop.f32.mrf.mxu0 }
0x14ae   :  { %v2410_v50 = vadd.f32 %v2406_v49, %v261_v47  ;;  %v2538_v47 = vld [vmem:[#allocation8 + $0x1d0] sm:$0xff]  ;;  %v2537_v49 = vld [vmem:[#allocation8 + $0x1c8] sm:$0xff] }
0x14af   :  { %v3041_v58 = vpop.f32.mrf.mxu0  ;;  %2578 = vmatpush1.msra.mxu0 %v2538_v47 }
0x14b0   :  { %v2749_v48 = vmul.f32 -1.442695, %v2410_v50  ;;  %v2536_v50 = vld [vmem:[#allocation8 + $0x1c0] sm:$0xff]  ;;  %2579 = vmatprep.subr.mxu0 %v2537_v49 }
0x14b1   :  { %2580 = vmatpush1.msra.mxu0 %v2536_v50 }
0x14b2   :  { %3149 = vpow2.f32 %v2749_v48 }
0x14b7   :  { %v3148_v59 = vpop.eup %3147 }
0x14b8   :  { %v2232_v10 = vadd.f32 1.0, %v3148_v59 }
0x14ba   :  { %3151 = vrcp.f32 %v2232_v10 }
0x14bf   :  { %v3150_v63 = vpop.eup %3149 }
0x14c0   :  { %v2414_v11 = vadd.f32 1.0, %v3150_v63 }
0x14c2   :  { %3153 = vrcp.f32 %v2414_v11 }
0x14c7   :  { %v3152_v3 = vpop.eup %3151 }
0x14c8   :  { %v2235_v4 = vmul.f32 2.0, %v3152_v3  ;;  %v2237_v7 = vmul.f32 %v3152_v3, %v3853_v16  ;;  %v2257_v16 = vld [vmem:[#allocation8 + $0x198] sm:$0xff] }
0x14c9   :  { %2295 = vmatprep.subr.mxu1 %v2257_v16 }
0x14ca   :  { %v2746_v62 = vadd.f32 -1.0, %v2235_v4  ;;  %2296 = vmatpush1.msra.mxu1 %v2256_v20 }
0x14cb   :  { %2297 = vmatprep.subr.mxu1 %v2255_v18 }
0x14cc   :  { %2239 = vrot.lane.b32.xlu0 %v2746_v62, %s3335_s1 }
0x14cf   :  { %v3154_v5 = vpop.eup %3153 }
0x14d0   :  { %v2417_v56 = vmul.f32 2.0, %v3154_v5  ;;  %v2419_v14 = vmul.f32 %v3154_v5, %v3857_v53  ;;  %v2254_v53 = vld [vmem:[#allocation8 + $0x180] sm:$0xff] }
0x14d1   :  { %2298 = vmatpush1.msra.mxu1 %v2254_v53 }
0x14d2   :  { %v2750_v12 = vadd.f32 -1.0, %v2417_v56  ;;  %3042 = vmatprep.subr.mxu1 %v3333_v0 }
0x14d4   :  { %2421 = vrot.lane.b32.xlu1 %v2750_v12, %s3335_s1 }
0x153e   :  { %v2240_v55 = vpop.permute.xlu0 %2239 }
0x153f   :  { %v2242_v61 = vmul.f32 %v3152_v3, %v2240_v55 }
0x1541   :  { %2244 = vrot.lane.b32.xlu0 %v2242_v61, %s3336_s29 }
0x1546   :  { %v2422_v13 = vpop.permute.xlu1 %2421 }
0x1547   :  { %v2424_v6 = vmul.f32 %v3154_v5, %v2422_v13 }
0x1549   :  { %2426 = vrot.lane.b32.xlu1 %v2424_v6, %s3336_s29 }
0x15b3   :  { %v2245_v8 = vpop.permute.xlu0 %2244 }
0x15b4   :  { %v3924_v9 = vadd.f32 %v2245_v8, %v2237_v7 }
0x15b6   :  { %3155 = vtanh.f32 %v3924_v9 }
0x15bb   :  { %v2427_v2 = vpop.permute.xlu1 %2426 }
0x15bc   :  { %v3928_v57 = vadd.f32 %v2427_v2, %v2419_v14 }
0x15be   :  { %3157 = vtanh.f32 %v3928_v57 }
0x15c3   :  { %v3156_v1 = vpop.eup %3155 }
0x15c4   :  { %2250 = vrot.lane.b32.xlu0 %v3156_v1, %s3335_s1 }
0x15cb   :  { %v3158_v21 = vpop.eup %3157 }
0x15cc   :  { %2432 = vrot.lane.b32.xlu1 %v3158_v21, %s3335_s1 }
0x1636   :  { %v2251_v22 = vpop.permute.xlu0 %2250 }
0x1637   :  { %v2253_v52 = vmul.f32 %v3152_v3, %v2251_v22 }
0x1639   :  { %2263 = vrot.lane.b32.xlu0 %v2253_v52, %s3336_s29 }
0x163e   :  { %v2433_v23 = vpop.permute.xlu1 %2432 }
0x163f   :  { %v2435_v54 = vmul.f32 %v3154_v5, %v2433_v23 }
0x1641   :  { %2437 = vrot.lane.b32.xlu1 %v2435_v54, %s3336_s29 }
0x16ab   :  { %v2264_v24 = vpop.permute.xlu0 %2263 }
0x16ac   :  { %2747 = vmatmul.mubr.msk.f32.vlgmr.msra.gmra.mxu1 %vm274_vm3, %v2264_v24 }
0x16ad   :  { %3043 = vmatpush3.msra.mxu1 %v3869_v43  ;;  %3050 = vmatprep.mubr.msk.f32.mxu1 %vm3334_vm0, %v3333_v0 }
0x16ae   :  { %3044 = vmatprep.subr.mxu1 %v3333_v0 }
0x16af   :  { %3045 = vmatpush3.msra.mxu1 %v3878_v41 }
0x16b0   :  { %3046 = vmatprep.subr.mxu1 %v3333_v0 }
0x16b1   :  { %3047 = vmatpush3.msra.mxu1 %v3885_v36 }
0x16b2   :  { %3048 = vmatprep.subr.mxu1 %v3333_v0 }
0x16b3   :  { %3049 = vmatpush3.msra.mxu1 %v3892_v31  ;;  %v2438_v51 = vpop.permute.xlu1 %2437 }
0x16b4   :  { %2622 = vst.msk [vmem:[#allocation11] sm:$0xff] %vm274_vm3, %v2438_v51  ;;  %3051 = vmatmul.mubr.msk.f32.vlgmr.msra.gmra.mxu1 %vm274_vm3, %v2438_v51 }
0x176c   :  { %v2333_v26 = vpop.f32.mrf.mxu1 }
0x176d   :  { %v2338_v30 = vadd.f32 %v3914_v39, %v2333_v26 }
0x176e   :  { %v2335_v25 = vpop.f32.mrf.mxu1 }
0x176f   :  { %v3949_v27 = vadd.f32 %v2335_v25, %v3909_v46 }
0x1774   :  { %v2507_v35 = vpop.f32.mrf.mxu1 }
0x1775   :  { %v2508_v38 = vadd.f32 %v2507_v35, %v2338_v30 }
0x1776   :  { %v3052_v32 = vpop.f32.mrf.mxu1 }
0x1777   :  { %v2752_v28 = vmul.f32 -1.442695, %v2508_v38 }
0x1779   :  { %3159 = vpow2.f32 %v2752_v28 }
0x1786   :  { %v3160_v0 = vpop.eup %3159 }
0x1787   :  { %v2514_v43 = vadd.f32 1.0, %v3160_v0 }
0x1789   :  { %3161 = vrcp.f32 %v2514_v43 }
0x1796   :  { %v3162_v41 = vpop.eup %3161 }
0x1797   :  { %v2517_v36 = vmul.f32 2.0, %v3162_v41  ;;  %v2519_v44 = vmul.f32 %v3162_v41, %v3924_v9 }
0x1799   :  { %v2753_v31 = vadd.f32 -1.0, %v2517_v36 }
0x179b   :  { %2521 = vrot.lane.b32.xlu0 %v2753_v31, %s3335_s1 }
0x180d   :  { %v2522_v29 = vpop.permute.xlu0 %2521 }
0x180e   :  { %v2524_v34 = vmul.f32 %v3162_v41, %v2522_v29 }
0x1810   :  { %2526 = vrot.lane.b32.xlu1 %v2524_v34, %s3336_s29 }
0x1882   :  { %v2527_v46 = vpop.permute.xlu1 %2526 }
0x1883   :  { %v2529_v39 = vadd.f32 %v2527_v46, %v2519_v44 }
0x1885   :  { %3163 = vtanh.f32 %v2529_v39 }
0x1892   :  { %v3164_v58 = vpop.eup %3163 }
0x1893   :  { %2532 = vrot.lane.b32.xlu0 %v3164_v58, %s3335_s1  ;;  %s3338_s1 = smov [#allocation11]  }
0x1894   :  { %s2652_s15 = sshll.u32 %s3338_s1, 4  ;;  %s2653_s15 = int_to_ptr.vmem [resolvable:$true] %s2652_s15 }
0x1895   :  { %s3255_s16 = scalar_lea.vmem %s2653_s15, 256  ;;  %p3260_p7 = scmp.lt.s32.totalorder %s2653_s15, %s2653_s15 }
0x1896   :  { %p3256_p6 = scmp.ne.s32.totalorder %s2653_s15, %s3255_s16  ;;  %p3261_p8 = scmp.lt.s32.totalorder %s3255_s16, %s3255_s16 }
0x1897   :  { %2627 = vrot.lane.b32.xlu0 %v3928_v57, %s3337_s8 }
0x1898   :  { %p3262_p9 = por %p3261_p8, %p3260_p7 }
0x189a   :  { %p3263_p10 = pnand %p3262_p9, %p3256_p6 }
0x1905   :  { %v2533_v48 = vpop.permute.xlu0 %2532 }
0x1906   :  { %v2535_v59 = vmul.f32 %v3162_v41, %v2533_v48 }
0x1908   :  { %2545 = vrot.lane.b32.xlu1 %v2535_v59, %s3336_s29 }
0x1909   :  { %v2628_v10 = vpop.permute.xlu0 %2627 }
0x190a   :  { %2630 = vst.msk [vmem:[#allocation13] sm:$0xff] %vm274_vm3, %v2628_v10 }
0x190c   :  { %2632 = vrot.lane.b32.xlu1 %v2529_v39, %s3337_s8 }
0x197a   :  { %v2546_v63 = vpop.permute.xlu1 %2545 }
0x197b   :  { %2625 = vst.msk [vmem:[#allocation11 + $0x8] sm:$0xff] %vm274_vm3, %v2546_v63  ;;  %2754 = vmatmul.mubr.msk.f32.vlgmr.msra.gmra.mxu0 %vm274_vm3, %v2546_v63 }
0x197e   :  { %v2633_v11 = vpop.permute.xlu1 %2632 }
0x197f   :  { %2636 = vst.msk [vmem:[#allocation13 + $0x8] sm:$0xff] %vm274_vm3, %v2633_v11 }
0x1980   :  { %3266 = shalt.err (!%p3263_p10)
}
0x1981   :  { %2658 = dma.vmem_to_hbm [thread:$0]  %s2653_s15, 256, %s3990_s12, [#allocation12], %s3327_s30, %s3327_s30, %s3328_s14  }
0x1982   :  { %s3339_s10 = smov [#allocation13]  }
0x1983   :  { %s2664_s18 = sshll.u32 %s3339_s10, 4  ;;  %s2665_s18 = int_to_ptr.vmem [resolvable:$true] %s2664_s18 }
0x1984   :  { %s3275_s19 = scalar_lea.vmem %s2665_s18, 256  ;;  %p3280_p12 = scmp.lt.s32.totalorder %s2665_s18, %s2665_s18 }
0x1985   :  { %p3276_p11 = scmp.ne.s32.totalorder %s2665_s18, %s3275_s19  ;;  %p3281_p13 = scmp.lt.s32.totalorder %s3275_s19, %s3275_s19 }
0x1987   :  { %p3282_p0 = por %p3281_p13, %p3280_p12 }
0x1989   :  { %p3283_p1 = pnand %p3282_p0, %p3276_p11 }
0x198b   :  { %3286 = shalt.err (!%p3283_p1)
}
0x198c   :  { %2670 = dma.vmem_to_hbm [thread:$0]  %s2665_s18, 256, %s3991_s13, [#allocation12], %s3327_s30, %s3327_s30, %s3328_s14  }
0x198d   :  { %s3340_s22 = smov [#allocation10]  }
0x198e   :  { %s2643_s12 = sshll.u32 %s3340_s22, 4  ;;  %s2644_s12 = int_to_ptr.vmem [resolvable:$true] %s2643_s12 }
0x198f   :  { %s3295_s23 = scalar_lea.vmem %s2644_s12, 128  ;;  %p3300_p3 = scmp.lt.s32.totalorder %s2644_s12, %s2644_s12 }
0x1990   :  { %p3296_p2 = scmp.ne.s32.totalorder %s2644_s12, %s3295_s23  ;;  %p3301_p4 = scmp.lt.s32.totalorder %s3295_s23, %s3295_s23 }
0x1992   :  { %p3302_p5 = por %p3301_p4, %p3300_p3 }
0x1994   :  { %p3303_p6 = pnand %p3302_p5, %p3296_p2 }
0x1a3b   :  { %v2615_v3 = vpop.f32.mrf.mxu0 }
0x1a3d   :  { %v2616_v4 = vpop.f32.mrf.mxu0 }
0x1a3e   :  { %v2619_v62 = vadd.f32 %v2616_v4, %v3949_v27 }
0x1a40   :  { %2620 = vst [vmem:[#allocation10] sm:$0xff] %v2619_v62 }
0x1a41   :  { %3306 = shalt.err (!%p3303_p6)
}
0x1a42   :  { %2646 = dma.vmem_to_hbm [thread:$0]  %s2644_s12, 128, %s3989_s11, [#allocation4]  }
0x1a43   :  { %3321 = dma.done.wait [#allocation4], 128  }
0x1a44   :  { %3322 = vsyncadd [#allocation4], 4294967168 }
0x1a45   :  { %3323 = dma.done.wait [#allocation12], 512  }
0x1a46   :  { %3324 = vsyncadd [#allocation12], 4294966784 }
0x1a47   :  { %2680 = vsyncpa [#allocation3], 1 }
0x1a48   :  { %2681 = vsyncpa [#allocation6], 1 }
0x1a49   :  { %2682 = vsyncpa [#allocation9], 1 }
0x1a4a   :  { %2683 = vsyncpa [#allocation4], 1 }
0x1a4b   :  { %2684 = vsyncpa [#allocation12], 1 }

</bundles_post_ra>
